<compile_context>
chip_gen: v6e
topology: v6e:2x2x1
jax: 0.10.0
libtpu: 0.0.40
codegen_flags: <defaults>
</compile_context>

<pallas_src>
import functools
import math

import jax
import jax.numpy as jnp
from jax.experimental import pallas as pl
from jax.experimental.pallas import tpu as pltpu


def _round_up(x, m):
    return ((x + m - 1) // m) * m


def _soft_supcon_kernel(feat_r_ref, feat_c_ref, lab_col_ref, lab_row_ref,
                        p_col_ref, p_row_ref, out_ref,
                        m_sc, l_sc, a_sc, c_sc, d_sc,
                        *, batch, n_valid, block_m, block_n, inv_temp, has_pad):
    i = pl.program_id(0)
    j = pl.program_id(1)
    nj = pl.num_programs(1)

    @pl.when(j == 0)
    def _init():
        m_sc[...] = jnp.full_like(m_sc, -jnp.inf)
        l_sc[...] = jnp.zeros_like(l_sc)
        a_sc[...] = jnp.zeros_like(a_sc)
        c_sc[...] = jnp.zeros_like(c_sc)
        d_sc[...] = jnp.zeros_like(d_sc)

    # Logits tile on the MXU: bf16 operands, f32 accumulation.
    logits = jax.lax.dot_general(
        feat_r_ref[...], feat_c_ref[...],
        (((1,), (1,)), ((), ())),
        preferred_element_type=jnp.float32) * inv_temp                 # [tm, tn]

    # Thin index vectors (modulo happens on [tm,1]/[1,tn] only).
    row_ids = i * block_m + jax.lax.broadcasted_iota(jnp.int32, (block_m, 1), 0)
    col_ids = j * block_n + jax.lax.broadcasted_iota(jnp.int32, (1, block_n), 1)
    not_diag = (row_ids % batch) != (col_ids % batch)                  # [tm, tn]
    keep = not_diag
    if has_pad:
        # Padded feature rows are all-zero -> logits 0, which would corrupt
        # the log-sum-exp; mask padded columns out.  Label/prob accumulators
        # do not need this: padded labels never match, padded probs are 0.
        keep = keep & (col_ids < n_valid)

    same = lab_col_ref[...] == lab_row_ref[...]                        # [tm, tn]

    # Online log-sum-exp over non-diagonal, in-range columns.
    m_prev = m_sc[...]
    m_new = jnp.maximum(m_prev, jnp.max(logits, axis=1, keepdims=True))
    e = jnp.where(keep, jnp.exp(logits - m_new), 0.0)
    l_sc[...] = l_sc[...] * jnp.exp(m_prev - m_new) + jnp.sum(e, axis=1, keepdims=True)
    m_sc[...] = m_new

    # Positive-pair weights p_j (the anchor prob p_i factors out of the row
    # sum and is applied once in the finalizer).
    pw = jnp.where(same & not_diag, p_row_ref[...], 0.0)               # [tm, tn]
    a_sc[...] += jnp.sum(pw * logits, axis=1, keepdims=True)
    c_sc[...] += jnp.sum(pw, axis=1, keepdims=True)
    # Denominator intentionally includes the diagonal self-matches, exactly
    # like mask.repeat(2,2).sum(1) in the PyTorch module.
    d_sc[...] += jnp.sum(same.astype(jnp.float32), axis=1, keepdims=True)

    @pl.when(j == nj - 1)
    def _finalize():
        log_denom = m_sc[...] + jnp.log(l_sc[...])                     # [tm, 1]
        num = -(a_sc[...] - c_sc[...] * log_denom) * p_col_ref[...]    # [tm, 1]
        # Padded anchor rows may have d == 0; clamp so no inf/NaN is produced
        # (those rows are sliced off in the wrapper).
        den = jnp.maximum(d_sc[...], 1.0)
        out_ref[...] = num / den


def soft_sup_con_loss(f1, f2, max_probs, labels, *, block_m=None, block_n=None):
    """Pallas implementation of SoftSupConLoss.forward (returns a scalar)."""
    B, D = f1.shape
    N = 2 * B

    features = jnp.concatenate([f1, f2], axis=0)                       # [N, D]
    labels2 = jnp.concatenate([labels, labels], axis=0).astype(jnp.int32)
    probs2 = jnp.concatenate([max_probs, max_probs], axis=0).astype(jnp.float32)

    # Tile sizes: block_m x block_n f32 temporaries stay well under the
    # default scoped VMEM limits on v5e/v6e/v7x.
    if block_m is None or block_n is None:
        if N <= 512:
            block_m = block_n = _round_up(N, 128)
        else:
            block_m, block_n = 256, 512
    Np = _round_up(N, math.lcm(block_m, block_n))
    Dp = _round_up(D, 128)
    has_pad = Np != N

    # Zero-pad: padded feature rows are all-zero, padded labels are
    # min(label)-1 (never equal to a real label), padded probs are 0.
    feat_p = jnp.zeros((Np, Dp), jnp.bfloat16)
    feat_p = feat_p.at[:N, :D].set(features.astype(jnp.bfloat16))
    pad_lab = jnp.min(labels2) - 1
    lab_p = jnp.full((Np,), pad_lab, jnp.int32).at[:N].set(labels2)
    prob_p = jnp.zeros((Np,), jnp.float32).at[:N].set(probs2)

    lab_col = lab_p.reshape(Np, 1)
    lab_row = lab_p.reshape(1, Np)
    p_col = prob_p.reshape(Np, 1)
    p_row = prob_p.reshape(1, Np)

    kernel = functools.partial(
        _soft_supcon_kernel, batch=B, n_valid=N,
        block_m=block_m, block_n=block_n, inv_temp=1.0 / 2.5, has_pad=has_pad)

    grid = (Np // block_m, Np // block_n)

    per_anchor = pl.pallas_call(
        kernel,
        grid=grid,
        in_specs=[
            pl.BlockSpec((block_m, Dp), lambda i, j: (i, 0)),   # anchor features
            pl.BlockSpec((block_n, Dp), lambda i, j: (j, 0)),   # contrast features
            pl.BlockSpec((block_m, 1), lambda i, j: (i, 0)),    # anchor labels
            pl.BlockSpec((1, block_n), lambda i, j: (0, j)),    # contrast labels
            pl.BlockSpec((block_m, 1), lambda i, j: (i, 0)),    # anchor probs
            pl.BlockSpec((1, block_n), lambda i, j: (0, j)),    # contrast probs
        ],
        out_specs=pl.BlockSpec((block_m, 1), lambda i, j: (i, 0)),
        out_shape=jax.ShapeDtypeStruct((Np, 1), jnp.float32),
        scratch_shapes=[pltpu.VMEM((block_m, 1), jnp.float32) for _ in range(5)],
        compiler_params=pltpu.CompilerParams(
            dimension_semantics=("parallel", "arbitrary"),
            vmem_limit_bytes=32 * 1024 * 1024),
    )(feat_p, feat_p, lab_col, lab_row, p_col, p_row)

    # Tiny final reduction over the N valid anchors (plain JAX glue).
    return jnp.mean(per_anchor[:N, 0])


def reference_loss(f1, f2, max_probs, labels):
    """Pure-JAX transcription of the PyTorch forward, for verification."""
    B = f1.shape[0]
    features = jnp.concatenate([f1, f2], axis=0)
    labels = labels.reshape(-1, 1)
    mask = (labels == labels.T).astype(jnp.float32)
    mp = max_probs.reshape(-1, 1)
    score_mask = mp @ mp.T
    mask_score = mask * score_mask
    logits_mask = jnp.tile(1.0 - jnp.eye(B, dtype=jnp.float32), (2, 2))
    adc = (features @ features.T) / 2.5
    mask_score2 = jnp.tile(mask_score, (2, 2)) * logits_mask
    exp_logits = jnp.exp(adc) * logits_mask
    log_prob = adc - jnp.log(exp_logits.sum(1, keepdims=True))
    mlp = -(mask_score2 * log_prob).sum(1) / jnp.tile(mask, (2, 2)).sum(1)
    return mlp.mean()


def _run_case(key, B, D, n_classes, **kw):
    k1, k2, k3, k4 = jax.random.split(key, 4)
    f1 = jax.random.normal(k1, (B, D), dtype=jnp.float32)
    f2 = jax.random.normal(k2, (B, D), dtype=jnp.float32)
    # typical contrastive features are L2-normalized (elementwise glue)
    f1 = f1 / jnp.linalg.norm(f1, axis=1, keepdims=True)
    f2 = f2 / jnp.linalg.norm(f2, axis=1, keepdims=True)
    max_probs = jax.random.uniform(k3, (B,), dtype=jnp.float32)
    labels = jax.random.randint(k4, (B,), 0, n_classes, dtype=jnp.int32)

    loss = jax.block_until_ready(soft_sup_con_loss(f1, f2, max_probs, labels, **kw))

    # f32 reference (kernel feeds the MXU bf16 -> loose tolerance) ...
    ref32 = reference_loss(f1, f2, max_probs, labels)
    assert jnp.allclose(loss, ref32, rtol=1e-2, atol=1e-2), (float(loss), float(ref32))
    # ... and a bf16-rounded-input reference (tight check of the kernel math).
    f1b = f1.astype(jnp.bfloat16).astype(jnp.float32)
    f2b = f2.astype(jnp.bfloat16).astype(jnp.float32)
    refb = reference_loss(f1b, f2b, max_probs, labels)
    assert jnp.allclose(loss, refb, rtol=2e-3, atol=2e-3), (float(loss), float(refb))
    return loss


if __name__ == "__main__":
    key = jax.random.PRNGKey(0)
    k_a, k_b = jax.random.split(key)

    # Small case: N=16 pads to a single 128x128 tile (exercises padding masks).
    _run_case(k_a, B=8, D=32, n_classes=4)
    # Multi-tile case: N=384 with 128x128 tiles -> 3x3 grid (exercises the
    # online accumulation across column tiles and the row-parallel axis).
    _run_case(k_b, B=192, D=64, n_classes=10, block_m=128, block_n=128)

    print("KERNEL_OK")
</pallas_src>

<mosaic_0001>
module attributes {stable_mosaic.version = 11 : i64} {
  func.func @_soft_supcon_kernel(%arg0: i32, %arg1: i32, %arg2: memref<128x128xbf16, #tpu.memory_space<vmem>>, %arg3: memref<128x128xbf16, #tpu.memory_space<vmem>>, %arg4: memref<128x1xi32, #tpu.memory_space<vmem>>, %arg5: memref<1x128xi32, #tpu.memory_space<vmem>>, %arg6: memref<128x1xf32, #tpu.memory_space<vmem>>, %arg7: memref<1x128xf32, #tpu.memory_space<vmem>>, %arg8: memref<128x1xf32, #tpu.memory_space<vmem>>, %arg9: memref<128x1xf32, #tpu.memory_space<vmem>>, %arg10: memref<128x1xf32, #tpu.memory_space<vmem>>, %arg11: memref<128x1xf32, #tpu.memory_space<vmem>>, %arg12: memref<128x1xf32, #tpu.memory_space<vmem>>, %arg13: memref<128x1xf32, #tpu.memory_space<vmem>>) attributes {dimension_semantics = [#tpu.dimension_semantics<parallel>, #tpu.dimension_semantics<arbitrary>], iteration_bounds = array<i64: 1, 1>, scalar_prefetch = 0 : i64, scratch_operands = 5 : i64, tpu.core_type = #tpu.core_type<tc>, window_params = [{transform_indices = @transform_0, window_bounds = array<i64: 128, 128>}, {transform_indices = @transform_1, window_bounds = array<i64: 128, 128>}, {transform_indices = @transform_2, window_bounds = array<i64: 128, 1>}, {transform_indices = @transform_3, window_bounds = array<i64: 1, 128>}, {transform_indices = @transform_4, window_bounds = array<i64: 128, 1>}, {transform_indices = @transform_5, window_bounds = array<i64: 1, 128>}, {transform_indices = @transform_6, window_bounds = array<i64: 128, 1>}]} {
    %c0_i32 = arith.constant 0 : i32
    %0 = arith.cmpi eq, %arg1, %c0_i32 : i32
    %1 = arith.extui %0 : i1 to i32
    %c0_i32_0 = arith.constant 0 : i32
    %2 = arith.cmpi ne, %1, %c0_i32_0 : i32
    scf.if %2 {
      %cst_51 = arith.constant 0xFF800000 : f32
      %105 = vector.broadcast %cst_51 : f32 to vector<128x1xf32>
      %c0_52 = arith.constant 0 : index
      %c0_53 = arith.constant 0 : index
      %106 = vector.load %arg9[%c0_52, %c0_53] : memref<128x1xf32, #tpu.memory_space<vmem>>, vector<128x1xf32>
      tpu.vector_store %arg9[%c0_52, %c0_53], %105 {strides = array<i32>} : memref<128x1xf32, #tpu.memory_space<vmem>>, vector<128x1xf32>,
      %cst_54 = arith.constant 0.000000e+00 : f32
      %107 = vector.broadcast %cst_54 : f32 to vector<128x1xf32>
      %c0_55 = arith.constant 0 : index
      %c0_56 = arith.constant 0 : index
      %108 = vector.load %arg10[%c0_55, %c0_56] : memref<128x1xf32, #tpu.memory_space<vmem>>, vector<128x1xf32>
      tpu.vector_store %arg10[%c0_55, %c0_56], %107 {strides = array<i32>} : memref<128x1xf32, #tpu.memory_space<vmem>>, vector<128x1xf32>,
      %cst_57 = arith.constant 0.000000e+00 : f32
      %109 = vector.broadcast %cst_57 : f32 to vector<128x1xf32>
      %c0_58 = arith.constant 0 : index
      %c0_59 = arith.constant 0 : index
      %110 = vector.load %arg11[%c0_58, %c0_59] : memref<128x1xf32, #tpu.memory_space<vmem>>, vector<128x1xf32>
      tpu.vector_store %arg11[%c0_58, %c0_59], %109 {strides = array<i32>} : memref<128x1xf32, #tpu.memory_space<vmem>>, vector<128x1xf32>,
      %cst_60 = arith.constant 0.000000e+00 : f32
      %111 = vector.broadcast %cst_60 : f32 to vector<128x1xf32>
      %c0_61 = arith.constant 0 : index
      %c0_62 = arith.constant 0 : index
      %112 = vector.load %arg12[%c0_61, %c0_62] : memref<128x1xf32, #tpu.memory_space<vmem>>, vector<128x1xf32>
      tpu.vector_store %arg12[%c0_61, %c0_62], %111 {strides = array<i32>} : memref<128x1xf32, #tpu.memory_space<vmem>>, vector<128x1xf32>,
      %cst_63 = arith.constant 0.000000e+00 : f32
      %113 = vector.broadcast %cst_63 : f32 to vector<128x1xf32>
      %c0_64 = arith.constant 0 : index
      %c0_65 = arith.constant 0 : index
      %114 = vector.load %arg13[%c0_64, %c0_65] : memref<128x1xf32, #tpu.memory_space<vmem>>, vector<128x1xf32>
      tpu.vector_store %arg13[%c0_64, %c0_65], %113 {strides = array<i32>} : memref<128x1xf32, #tpu.memory_space<vmem>>, vector<128x1xf32>,
    } else {
    }
    %c0 = arith.constant 0 : index
    %c0_1 = arith.constant 0 : index
    %3 = vector.load %arg2[%c0, %c0_1] : memref<128x128xbf16, #tpu.memory_space<vmem>>, vector<128x128xbf16>
    %c0_2 = arith.constant 0 : index
    %c0_3 = arith.constant 0 : index
    %4 = vector.load %arg3[%c0_2, %c0_3] : memref<128x128xbf16, #tpu.memory_space<vmem>>, vector<128x128xbf16>
    %cst = arith.constant dense<0.000000e+00> : vector<128x128xf32>
    %5 = tpu.matmul %3, %4, %cst {dimension_numbers = #tpu.dot_dimension_numbers<[1], [1], [0], [0], [0, 0, 1, 0], [], []>} : vector<128x128xbf16>, vector<128x128xbf16>, vector<128x128xf32> -> vector<128x128xf32>
    %cst_4 = arith.constant 4.000000e-01 : f32
    %6 = vector.broadcast %cst_4 : f32 to vector<128x128xf32>
    %7 = arith.mulf %5, %6 : vector<128x128xf32>
    %c128_i32 = arith.constant 128 : i32
    %8 = arith.muli %arg0, %c128_i32 : i32
    %9 = tpu.iota {dimensions = array<i32: 0>} : vector<128x1xi32>
    %10 = vector.broadcast %8 : i32 to vector<128x1xi32>
    %11 = arith.addi %10, %9 : vector<128x1xi32>
    %c128_i32_5 = arith.constant 128 : i32
    %12 = arith.muli %arg1, %c128_i32_5 : i32
    %13 = tpu.iota {dimensions = array<i32: 1>} : vector<1x128xi32>
    %14 = vector.broadcast %12 : i32 to vector<1x128xi32>
    %15 = arith.addi %14, %13 : vector<1x128xi32>
    %c8_i32 = arith.constant 8 : i32
    %c0_i32_6 = arith.constant 0 : i32
    %16 = arith.cmpi eq, %c8_i32, %c0_i32_6 : i32
    %c1_i32 = arith.constant 1 : i32
    %17 = arith.select %16, %c1_i32, %c8_i32 : i32
    %18 = vector.broadcast %17 : i32 to vector<128x1xi32>
    %19 = arith.remsi %11, %18 : vector<128x1xi32>
    %c0_i32_7 = arith.constant 0 : i32
    %20 = vector.broadcast %c0_i32_7 : i32 to vector<128x1xi32>
    %21 = arith.cmpi ne, %19, %20 : vector<128x1xi32>
    %c0_i32_8 = arith.constant 0 : i32
    %22 = vector.broadcast %c0_i32_8 : i32 to vector<128x1xi32>
    %23 = arith.cmpi slt, %19, %22 : vector<128x1xi32>
    %c0_i32_9 = arith.constant 0 : i32
    %24 = arith.cmpi slt, %17, %c0_i32_9 : i32
    %25 = vector.broadcast %24 : i1 to vector<128x1xi1>
    %26 = vector.broadcast %25 : vector<128x1xi1> to vector<128x1xi1>
    %27 = arith.xori %23, %26 : vector<128x1xi1>
    %28 = arith.andi %27, %21 : vector<128x1xi1>
    %29 = vector.broadcast %17 : i32 to vector<128x1xi32>
    %30 = arith.addi %19, %29 : vector<128x1xi32>
    %31 = arith.select %28, %30, %19 : vector<128x1xi1>, vector<128x1xi32>
    %c8_i32_10 = arith.constant 8 : i32
    %c0_i32_11 = arith.constant 0 : i32
    %32 = arith.cmpi eq, %c8_i32_10, %c0_i32_11 : i32
    %c1_i32_12 = arith.constant 1 : i32
    %33 = arith.select %32, %c1_i32_12, %c8_i32_10 : i32
    %34 = vector.broadcast %33 : i32 to vector<1x128xi32>
    %35 = arith.remsi %15, %34 : vector<1x128xi32>
    %c0_i32_13 = arith.constant 0 : i32
    %36 = vector.broadcast %c0_i32_13 : i32 to vector<1x128xi32>
    %37 = arith.cmpi ne, %35, %36 : vector<1x128xi32>
    %c0_i32_14 = arith.constant 0 : i32
    %38 = vector.broadcast %c0_i32_14 : i32 to vector<1x128xi32>
    %39 = arith.cmpi slt, %35, %38 : vector<1x128xi32>
    %c0_i32_15 = arith.constant 0 : i32
    %40 = arith.cmpi slt, %33, %c0_i32_15 : i32
    %41 = vector.broadcast %40 : i1 to vector<1x128xi1>
    %42 = vector.broadcast %41 : vector<1x128xi1> to vector<1x128xi1>
    %43 = arith.xori %39, %42 : vector<1x128xi1>
    %44 = arith.andi %43, %37 : vector<1x128xi1>
    %45 = vector.broadcast %33 : i32 to vector<1x128xi32>
    %46 = arith.addi %35, %45 : vector<1x128xi32>
    %47 = arith.select %44, %46, %35 : vector<1x128xi1>, vector<1x128xi32>
    %48 = vector.broadcast %31 : vector<128x1xi32> to vector<128x128xi32>
    %49 = vector.broadcast %47 : vector<1x128xi32> to vector<128x128xi32>
    %50 = arith.cmpi ne, %48, %49 : vector<128x128xi32>
    %c16_i32 = arith.constant 16 : i32
    %51 = vector.broadcast %c16_i32 : i32 to vector<1x128xi32>
    %52 = arith.cmpi slt, %15, %51 : vector<1x128xi32>
    %53 = vector.broadcast %52 : vector<1x128xi1> to vector<128x128xi1>
    %54 = arith.andi %50, %53 : vector<128x128xi1>
    %c0_16 = arith.constant 0 : index
    %c0_17 = arith.constant 0 : index
    %55 = vector.load %arg4[%c0_16, %c0_17] : memref<128x1xi32, #tpu.memory_space<vmem>>, vector<128x1xi32>
    %c0_18 = arith.constant 0 : index
    %c0_19 = arith.constant 0 : index
    %56 = vector.load %arg5[%c0_18, %c0_19] : memref<1x128xi32, #tpu.memory_space<vmem>>, vector<1x128xi32>
    %57 = vector.broadcast %55 : vector<128x1xi32> to vector<128x128xi32>
    %58 = vector.broadcast %56 : vector<1x128xi32> to vector<128x128xi32>
    %59 = arith.cmpi eq, %57, %58 : vector<128x128xi32>
    %c0_20 = arith.constant 0 : index
    %c0_21 = arith.constant 0 : index
    %60 = vector.load %arg9[%c0_20, %c0_21] : memref<128x1xf32, #tpu.memory_space<vmem>>, vector<128x1xf32>
    %cst_22 = arith.constant dense<0xFF800000> : vector<128xf32>
    %61 = vector.multi_reduction <maximumf>, %7, %cst_22 [1] : vector<128x128xf32> to vector<128xf32>
    %62 = vector.shape_cast %61 : vector<128xf32> to vector<128x1xf32>
    %63 = arith.maximumf %60, %62 : vector<128x1xf32>
    %64 = vector.broadcast %63 : vector<128x1xf32> to vector<128x128xf32>
    %65 = arith.subf %7, %64 : vector<128x128xf32>
    %66 = math.exp %65 : vector<128x128xf32>
    %cst_23 = arith.constant 0.000000e+00 : f32
    %67 = vector.broadcast %cst_23 : f32 to vector<128x128xf32>
    %68 = arith.select %54, %66, %67 : vector<128x128xi1>, vector<128x128xf32>
    %c0_24 = arith.constant 0 : index
    %c0_25 = arith.constant 0 : index
    %69 = vector.load %arg10[%c0_24, %c0_25] : memref<128x1xf32, #tpu.memory_space<vmem>>, vector<128x1xf32>
    %70 = arith.subf %60, %63 : vector<128x1xf32>
    %71 = math.exp %70 : vector<128x1xf32>
    %72 = arith.mulf %69, %71 : vector<128x1xf32>
    %cst_26 = arith.constant dense<0.000000e+00> : vector<128xf32>
    %73 = vector.multi_reduction <add>, %68, %cst_26 [1] : vector<128x128xf32> to vector<128xf32>
    %74 = vector.shape_cast %73 : vector<128xf32> to vector<128x1xf32>
    %75 = arith.addf %72, %74 : vector<128x1xf32>
    %c0_27 = arith.constant 0 : index
    %c0_28 = arith.constant 0 : index
    %76 = vector.load %arg10[%c0_27, %c0_28] : memref<128x1xf32, #tpu.memory_space<vmem>>, vector<128x1xf32>
    tpu.vector_store %arg10[%c0_27, %c0_28], %75 {strides = array<i32>} : memref<128x1xf32, #tpu.memory_space<vmem>>, vector<128x1xf32>,
    %c0_29 = arith.constant 0 : index
    %c0_30 = arith.constant 0 : index
    %77 = vector.load %arg9[%c0_29, %c0_30] : memref<128x1xf32, #tpu.memory_space<vmem>>, vector<128x1xf32>
    tpu.vector_store %arg9[%c0_29, %c0_30], %63 {strides = array<i32>} : memref<128x1xf32, #tpu.memory_space<vmem>>, vector<128x1xf32>,
    %78 = arith.andi %59, %50 : vector<128x128xi1>
    %c0_31 = arith.constant 0 : index
    %c0_32 = arith.constant 0 : index
    %79 = vector.load %arg7[%c0_31, %c0_32] : memref<1x128xf32, #tpu.memory_space<vmem>>, vector<1x128xf32>
    %cst_33 = arith.constant 0.000000e+00 : f32
    %80 = vector.shape_cast %79 : vector<1x128xf32> to vector<1x128xf32>
    %81 = vector.broadcast %80 : vector<1x128xf32> to vector<128x128xf32>
    %82 = vector.broadcast %cst_33 : f32 to vector<128x128xf32>
    %83 = arith.select %78, %81, %82 : vector<128x128xi1>, vector<128x128xf32>
    %c0_34 = arith.constant 0 : index
    %c0_35 = arith.constant 0 : index
    %84 = vector.load %arg11[%c0_34, %c0_35] : memref<128x1xf32, #tpu.memory_space<vmem>>, vector<128x1xf32>
    %85 = arith.mulf %83, %7 : vector<128x128xf32>
    %cst_36 = arith.constant dense<0.000000e+00> : vector<128xf32>
    %86 = vector.multi_reduction <add>, %85, %cst_36 [1] : vector<128x128xf32> to vector<128xf32>
    %87 = vector.shape_cast %86 : vector<128xf32> to vector<128x1xf32>
    %88 = arith.addf %84, %87 : vector<128x1xf32>
    %c0_37 = arith.constant 0 : index
    %c0_38 = arith.constant 0 : index
    %89 = vector.load %arg11[%c0_37, %c0_38] : memref<128x1xf32, #tpu.memory_space<vmem>>, vector<128x1xf32>
    tpu.vector_store %arg11[%c0_37, %c0_38], %88 {strides = array<i32>} : memref<128x1xf32, #tpu.memory_space<vmem>>, vector<128x1xf32>,
    %c0_39 = arith.constant 0 : index
    %c0_40 = arith.constant 0 : index
    %90 = vector.load %arg12[%c0_39, %c0_40] : memref<128x1xf32, #tpu.memory_space<vmem>>, vector<128x1xf32>
    %cst_41 = arith.constant dense<0.000000e+00> : vector<128xf32>
    %91 = vector.multi_reduction <add>, %83, %cst_41 [1] : vector<128x128xf32> to vector<128xf32>
    %92 = vector.shape_cast %91 : vector<128xf32> to vector<128x1xf32>
    %93 = arith.addf %90, %92 : vector<128x1xf32>
    %c0_42 = arith.constant 0 : index
    %c0_43 = arith.constant 0 : index
    %94 = vector.load %arg12[%c0_42, %c0_43] : memref<128x1xf32, #tpu.memory_space<vmem>>, vector<128x1xf32>
    tpu.vector_store %arg12[%c0_42, %c0_43], %93 {strides = array<i32>} : memref<128x1xf32, #tpu.memory_space<vmem>>, vector<128x1xf32>,
    %c0_44 = arith.constant 0 : index
    %c0_45 = arith.constant 0 : index
    %95 = vector.load %arg13[%c0_44, %c0_45] : memref<128x1xf32, #tpu.memory_space<vmem>>, vector<128x1xf32>
    %96 = arith.extui %59 : vector<128x128xi1> to vector<128x128xi32>
    %97 = arith.sitofp %96 : vector<128x128xi32> to vector<128x128xf32>
    %cst_46 = arith.constant dense<0.000000e+00> : vector<128xf32>
    %98 = vector.multi_reduction <add>, %97, %cst_46 [1] : vector<128x128xf32> to vector<128xf32>
    %99 = vector.shape_cast %98 : vector<128xf32> to vector<128x1xf32>
    %100 = arith.addf %95, %99 : vector<128x1xf32>
    %c0_47 = arith.constant 0 : index
    %c0_48 = arith.constant 0 : index
    %101 = vector.load %arg13[%c0_47, %c0_48] : memref<128x1xf32, #tpu.memory_space<vmem>>, vector<128x1xf32>
    tpu.vector_store %arg13[%c0_47, %c0_48], %100 {strides = array<i32>} : memref<128x1xf32, #tpu.memory_space<vmem>>, vector<128x1xf32>,
    %c0_i32_49 = arith.constant 0 : i32
    %102 = arith.cmpi eq, %arg1, %c0_i32_49 : i32
    %103 = arith.extui %102 : i1 to i32
    %c0_i32_50 = arith.constant 0 : i32
    %104 = arith.cmpi ne, %103, %c0_i32_50 : i32
    scf.if %104 {
      %c0_51 = arith.constant 0 : index
      %c0_52 = arith.constant 0 : index
      %105 = vector.load %arg9[%c0_51, %c0_52] : memref<128x1xf32, #tpu.memory_space<vmem>>, vector<128x1xf32>
      %c0_53 = arith.constant 0 : index
      %c0_54 = arith.constant 0 : index
      %106 = vector.load %arg10[%c0_53, %c0_54] : memref<128x1xf32, #tpu.memory_space<vmem>>, vector<128x1xf32>
      %107 = math.log %106 : vector<128x1xf32>
      %108 = arith.addf %105, %107 : vector<128x1xf32>
      %c0_55 = arith.constant 0 : index
      %c0_56 = arith.constant 0 : index
      %109 = vector.load %arg11[%c0_55, %c0_56] : memref<128x1xf32, #tpu.memory_space<vmem>>, vector<128x1xf32>
      %c0_57 = arith.constant 0 : index
      %c0_58 = arith.constant 0 : index
      %110 = vector.load %arg12[%c0_57, %c0_58] : memref<128x1xf32, #tpu.memory_space<vmem>>, vector<128x1xf32>
      %111 = arith.mulf %110, %108 : vector<128x1xf32>
      %112 = arith.subf %109, %111 : vector<128x1xf32>
      %cst_59 = arith.constant 0.000000e+00 : f32
      %113 = vector.broadcast %cst_59 : f32 to vector<128x1xf32>
      %114 = arith.subf %113, %112 : vector<128x1xf32>
      %c0_60 = arith.constant 0 : index
      %c0_61 = arith.constant 0 : index
      %115 = vector.load %arg6[%c0_60, %c0_61] : memref<128x1xf32, #tpu.memory_space<vmem>>, vector<128x1xf32>
      %116 = arith.mulf %114, %115 : vector<128x1xf32>
      %c0_62 = arith.constant 0 : index
      %c0_63 = arith.constant 0 : index
      %117 = vector.load %arg13[%c0_62, %c0_63] : memref<128x1xf32, #tpu.memory_space<vmem>>, vector<128x1xf32>
      %cst_64 = arith.constant 1.000000e+00 : f32
      %118 = vector.broadcast %cst_64 : f32 to vector<128x1xf32>
      %119 = arith.maximumf %117, %118 : vector<128x1xf32>
      %120 = arith.divf %116, %119 : vector<128x1xf32>
      %c0_65 = arith.constant 0 : index
      %c0_66 = arith.constant 0 : index
      %121 = vector.load %arg8[%c0_65, %c0_66] : memref<128x1xf32, #tpu.memory_space<vmem>>, vector<128x1xf32>
      tpu.vector_store %arg8[%c0_65, %c0_66], %120 {strides = array<i32>} : memref<128x1xf32, #tpu.memory_space<vmem>>, vector<128x1xf32>,
    } else {
    }
    return
  }
  func.func @transform_0(%arg0: i32, %arg1: i32) -> (i32, i32) {
    %c0_i32 = arith.constant 0 : i32
    %c0_i32_0 = arith.constant 0 : i32
    return %arg0, %c0_i32 : i32, i32
  }
  func.func @transform_1(%arg0: i32, %arg1: i32) -> (i32, i32) {
    %c0_i32 = arith.constant 0 : i32
    %c0_i32_0 = arith.constant 0 : i32
    return %arg1, %c0_i32 : i32, i32
  }
  func.func @transform_2(%arg0: i32, %arg1: i32) -> (i32, i32) {
    %c0_i32 = arith.constant 0 : i32
    %c0_i32_0 = arith.constant 0 : i32
    return %arg0, %c0_i32 : i32, i32
  }
  func.func @transform_3(%arg0: i32, %arg1: i32) -> (i32, i32) {
    %c0_i32 = arith.constant 0 : i32
    %c0_i32_0 = arith.constant 0 : i32
    return %c0_i32, %arg1 : i32, i32
  }
  func.func @transform_4(%arg0: i32, %arg1: i32) -> (i32, i32) {
    %c0_i32 = arith.constant 0 : i32
    %c0_i32_0 = arith.constant 0 : i32
    return %arg0, %c0_i32 : i32, i32
  }
  func.func @transform_5(%arg0: i32, %arg1: i32) -> (i32, i32) {
    %c0_i32 = arith.constant 0 : i32
    %c0_i32_0 = arith.constant 0 : i32
    return %c0_i32, %arg1 : i32, i32
  }
  func.func @transform_6(%arg0: i32, %arg1: i32) -> (i32, i32) {
    %c0_i32 = arith.constant 0 : i32
    %c0_i32_0 = arith.constant 0 : i32
    return %arg0, %c0_i32 : i32, i32
  }
}

</mosaic_0001>

<bundles_post_ra>
// kernel: tpu_custom_call.1
= control target key start
LH: loop header
LB: loop body
LE: loop exit
PB: predicated region body
PF: predicated region fallthrough
CT: control target
= control target key end

     0   :  { %v1936_v1 = vmov 0   ;;  %v1937_v35 = vmov 0.0   ;;  %vm28_vm15 = vcmask 7168   ;;  %s3099_s1 = inlined_call_operand.vmem [shape: bf16[128,128], index: 1, kind: input, shape index: {}]   ;;  %s3100_s0 = inlined_call_operand.vmem [shape: bf16[128,128], index: 0, kind: input, shape index: {}]   ;;  %s3101_s2 = inlined_call_operand.vmem [shape: s32[128,1], index: 2, kind: input, shape index: {}]   ;;  %s3102_s3 = inlined_call_operand.vmem [shape: s32[1,128], index: 3, kind: input, shape index: {}]   ;;  %s3103_s5 = inlined_call_operand.vmem [shape: f32[1,128], index: 5, kind: input, shape index: {}]   ;;  %s3104_s4 = inlined_call_operand.vmem [shape: f32[128,1], index: 4, kind: input, shape index: {}]   ;;  %s3105_s6 = inlined_call_operand.vmem [shape: f32[128,1], index: 6, kind: output, shape index: {}]  }
   0x1   :  { %v1792_v0 = vld [vmem:[%s3099_s1 + $0x38] sm:$0xff]   ;;  %1790 = vset.pattern.permute.xlu0 %v1936_v1  ;;  %1791 = vset.pattern.permute.xlu1 %v1936_v1  ;;  %v1793_v2 = vld [vmem:[%s3099_s1 + $0x30] sm:$0xff]   ;;  %v1794_v3 = vld [vmem:[%s3099_s1 + $0x28] sm:$0xff]   ;;  %93 = vst.msk [vmem:[#allocation6] sm:$0xff] %vm28_vm15, %v1937_v35 }
   0x2   :  { %1739 = vmatprep.subr.bf16.mxu0 %v1792_v0  ;;  %1771 = vmatprep.subr.bf16.mxu1 %v1792_v0  ;;  %v1800_v4 = vld [vmem:[%s3100_s0] sm:$0xff]   ;;  %v631_v8 = vld [vmem:[%s3101_s2 + $0x10] sm:$0xff]  ;;  %v630_v9 = vld [vmem:[%s3101_s2 + $0x8] sm:$0xff]  ;;  %45 = vst.msk [vmem:[#allocation3] sm:$0xff] %vm28_vm15, %v1937_v35 }
   0x3   :  { %1740 = vmatpush3.bf16.xpose.msra.mxu0 %v1792_v0  ;;  %1779 = vmatpush3.bf16.xpose.msra.mxu1 %v1792_v0  ;;  %v1801_v5 = vld [vmem:[%s3100_s0 + $0x20] sm:$0xff]   ;;  %v632_v10 = vld [vmem:[%s3101_s2 + $0x18] sm:$0xff]  ;;  %v634_v12 = vld [vmem:[%s3101_s2 + $0x28] sm:$0xff]  ;;  %46 = vst.msk [vmem:[#allocation3 + $0x8] sm:$0xff] %vm28_vm15, %v1937_v35  ;;  %v1938_v0 = vmov -inf  }
   0x4   :  { %1741 = vmatprep.subr.bf16.mxu0 %v1793_v2  ;;  %1772 = vmatprep.subr.bf16.mxu1 %v1793_v2  ;;  %v1795_v6 = vld [vmem:[%s3099_s1 + $0x20] sm:$0xff]   ;;  %v1796_v13 = vld [vmem:[%s3099_s1 + $0x18] sm:$0xff]   ;;  %v635_v14 = vld [vmem:[%s3101_s2 + $0x30] sm:$0xff]  ;;  %47 = vst.msk [vmem:[#allocation3 + $0x10] sm:$0xff] %vm28_vm15, %v1937_v35 }
   0x5   :  { %1755 = vmatprep.mubr.bf16.mxu0 %v1800_v4  ;;  %1763 = vmatprep.mubr.bf16.mxu1 %v1801_v5  ;;  %v629_v7 = vld [vmem:[%s3101_s2] sm:$0xff]  ;;  %v636_v15 = vld [vmem:[%s3101_s2 + $0x38] sm:$0xff]  ;;  %v638_v17 = vld [vmem:[%s3101_s2 + $0x48] sm:$0xff]  ;;  %48 = vst.msk [vmem:[#allocation3 + $0x18] sm:$0xff] %vm28_vm15, %v1937_v35 }
   0x6   :  { %647 = vperm.xlu0 %1790, %v629_v7   ;;  %653 = vperm.xlu1 %1791, %v631_v8   ;;  %v633_v11 = vld [vmem:[%s3101_s2 + $0x20] sm:$0xff]  ;;  %v1797_v18 = vld [vmem:[%s3099_s1 + $0x10] sm:$0xff]   ;;  %v640_v20 = vld [vmem:[%s3101_s2 + $0x58] sm:$0xff]  ;;  %49 = vst.msk [vmem:[#allocation3 + $0x20] sm:$0xff] %vm28_vm15, %v1937_v35 }
   0x7   :  { %v637_v16 = vld [vmem:[%s3101_s2 + $0x40] sm:$0xff]  ;;  %v639_v19 = vld [vmem:[%s3101_s2 + $0x50] sm:$0xff]  ;;  %v642_v22 = vld [vmem:[%s3101_s2 + $0x68] sm:$0xff]  ;;  %50 = vst.msk [vmem:[#allocation3 + $0x28] sm:$0xff] %vm28_vm15, %v1937_v35 }
   0x8   :  { %v641_v21 = vld [vmem:[%s3101_s2 + $0x60] sm:$0xff]  ;;  %v1798_v23 = vld [vmem:[%s3099_s1 + $0x8] sm:$0xff]   ;;  %v643_v24 = vld [vmem:[%s3101_s2 + $0x70] sm:$0xff]  ;;  %51 = vst.msk [vmem:[#allocation3 + $0x30] sm:$0xff] %vm28_vm15, %v1937_v35 }
   0x9   :  { %v1799_v25 = vld [vmem:[%s3099_s1] sm:$0xff]   ;;  %v1802_v26 = vld [vmem:[%s3100_s0 + $0x8] sm:$0xff]   ;;  %v1804_v28 = vld [vmem:[%s3100_s0 + $0x10] sm:$0xff]   ;;  %52 = vst.msk [vmem:[#allocation3 + $0x38] sm:$0xff] %vm28_vm15, %v1937_v35 }
   0xa   :  { %650 = vperm.xlu0 %1790, %v630_v9   ;;  %656 = vperm.xlu1 %1791, %v632_v10   ;;  %v1803_v27 = vld [vmem:[%s3100_s0 + $0x28] sm:$0xff]   ;;  %v1805_v29 = vld [vmem:[%s3100_s0 + $0x30] sm:$0xff]   ;;  %v1806_v30 = vld [vmem:[%s3100_s0 + $0x18] sm:$0xff]   ;;  %53 = vst.msk [vmem:[#allocation3 + $0x40] sm:$0xff] %vm28_vm15, %v1937_v35 }
   0xb   :  { %1742 = vmatpush3.bf16.xpose.msra.mxu0 %v1793_v2  ;;  %1780 = vmatpush3.bf16.xpose.msra.mxu1 %v1793_v2  ;;  %v1807_v31 = vld [vmem:[%s3100_s0 + $0x38] sm:$0xff]   ;;  %v2070_v32 = vld [vmem:[%s3102_s3] ss:$0 sm:$0xff]  ;;  %54 = vst.msk [vmem:[#allocation3 + $0x48] sm:$0xff] %vm28_vm15, %v1937_v35  ;;  %55 = vst.msk [vmem:[#allocation3 + $0x50] sm:$0xff] %vm28_vm15, %v1937_v35 }
   0xc   :  { %1743 = vmatprep.subr.bf16.mxu0 %v1794_v3  ;;  %1773 = vmatprep.subr.bf16.mxu1 %v1794_v3  ;;  %56 = vst.msk [vmem:[#allocation3 + $0x58] sm:$0xff] %vm28_vm15, %v1937_v35  ;;  %57 = vst.msk [vmem:[#allocation3 + $0x60] sm:$0xff] %vm28_vm15, %v1937_v35 }
   0xd   :  { %58 = vst.msk [vmem:[#allocation3 + $0x68] sm:$0xff] %vm28_vm15, %v1937_v35  ;;  %59 = vst.msk [vmem:[#allocation3 + $0x70] sm:$0xff] %vm28_vm15, %v1937_v35 }
   0xe   :  { %659 = vperm.xlu0 %1790, %v633_v11   ;;  %662 = vperm.xlu1 %1791, %v634_v12   ;;  %60 = vst.msk [vmem:[#allocation3 + $0x78] sm:$0xff] %vm28_vm15, %v1937_v35  ;;  %61 = vst.msk [vmem:[#allocation4] sm:$0xff] %vm28_vm15, %v1937_v35 }
   0xf   :  { %62 = vst.msk [vmem:[#allocation4 + $0x8] sm:$0xff] %vm28_vm15, %v1937_v35  ;;  %63 = vst.msk [vmem:[#allocation4 + $0x10] sm:$0xff] %vm28_vm15, %v1937_v35 }
  0x10   :  { %64 = vst.msk [vmem:[#allocation4 + $0x18] sm:$0xff] %vm28_vm15, %v1937_v35  ;;  %65 = vst.msk [vmem:[#allocation4 + $0x20] sm:$0xff] %vm28_vm15, %v1937_v35 }
  0x11   :  { %66 = vst.msk [vmem:[#allocation4 + $0x28] sm:$0xff] %vm28_vm15, %v1937_v35  ;;  %67 = vst.msk [vmem:[#allocation4 + $0x30] sm:$0xff] %vm28_vm15, %v1937_v35 }
  0x12   :  { %665 = vperm.xlu0 %1790, %v635_v14   ;;  %668 = vperm.xlu1 %1791, %v636_v15   ;;  %68 = vst.msk [vmem:[#allocation4 + $0x38] sm:$0xff] %vm28_vm15, %v1937_v35  ;;  %69 = vst.msk [vmem:[#allocation4 + $0x40] sm:$0xff] %vm28_vm15, %v1937_v35 }
  0x13   :  { %1744 = vmatpush3.bf16.xpose.msra.mxu0 %v1794_v3  ;;  %1781 = vmatpush3.bf16.xpose.msra.mxu1 %v1794_v3  ;;  %70 = vst.msk [vmem:[#allocation4 + $0x48] sm:$0xff] %vm28_vm15, %v1937_v35  ;;  %71 = vst.msk [vmem:[#allocation4 + $0x50] sm:$0xff] %vm28_vm15, %v1937_v35 }
  0x14   :  { %1745 = vmatprep.subr.bf16.mxu0 %v1795_v6  ;;  %1774 = vmatprep.subr.bf16.mxu1 %v1795_v6  ;;  %72 = vst.msk [vmem:[#allocation4 + $0x58] sm:$0xff] %vm28_vm15, %v1937_v35  ;;  %73 = vst.msk [vmem:[#allocation4 + $0x60] sm:$0xff] %vm28_vm15, %v1937_v35 }
  0x15   :  { %74 = vst.msk [vmem:[#allocation4 + $0x68] sm:$0xff] %vm28_vm15, %v1937_v35  ;;  %75 = vst.msk [vmem:[#allocation4 + $0x70] sm:$0xff] %vm28_vm15, %v1937_v35 }
  0x16   :  { %671 = vperm.xlu0 %1790, %v637_v16   ;;  %674 = vperm.xlu1 %1791, %v638_v17   ;;  %76 = vst.msk [vmem:[#allocation4 + $0x78] sm:$0xff] %vm28_vm15, %v1937_v35  ;;  %77 = vst.msk [vmem:[#allocation5] sm:$0xff] %vm28_vm15, %v1937_v35 }
  0x17   :  { %78 = vst.msk [vmem:[#allocation5 + $0x8] sm:$0xff] %vm28_vm15, %v1937_v35  ;;  %79 = vst.msk [vmem:[#allocation5 + $0x10] sm:$0xff] %vm28_vm15, %v1937_v35 }
  0x18   :  { %80 = vst.msk [vmem:[#allocation5 + $0x18] sm:$0xff] %vm28_vm15, %v1937_v35  ;;  %81 = vst.msk [vmem:[#allocation5 + $0x20] sm:$0xff] %vm28_vm15, %v1937_v35 }
  0x19   :  { %82 = vst.msk [vmem:[#allocation5 + $0x28] sm:$0xff] %vm28_vm15, %v1937_v35  ;;  %83 = vst.msk [vmem:[#allocation5 + $0x30] sm:$0xff] %vm28_vm15, %v1937_v35 }
  0x1a   :  { %677 = vperm.xlu0 %1790, %v639_v19   ;;  %680 = vperm.xlu1 %1791, %v640_v20   ;;  %84 = vst.msk [vmem:[#allocation5 + $0x38] sm:$0xff] %vm28_vm15, %v1937_v35  ;;  %85 = vst.msk [vmem:[#allocation5 + $0x40] sm:$0xff] %vm28_vm15, %v1937_v35 }
  0x1b   :  { %1746 = vmatpush3.bf16.xpose.msra.mxu0 %v1795_v6  ;;  %1782 = vmatpush3.bf16.xpose.msra.mxu1 %v1795_v6  ;;  %86 = vst.msk [vmem:[#allocation5 + $0x48] sm:$0xff] %vm28_vm15, %v1937_v35  ;;  %87 = vst.msk [vmem:[#allocation5 + $0x50] sm:$0xff] %vm28_vm15, %v1937_v35 }
  0x1c   :  { %1747 = vmatprep.subr.bf16.mxu0 %v1796_v13  ;;  %1775 = vmatprep.subr.bf16.mxu1 %v1796_v13  ;;  %88 = vst.msk [vmem:[#allocation5 + $0x58] sm:$0xff] %vm28_vm15, %v1937_v35  ;;  %89 = vst.msk [vmem:[#allocation5 + $0x60] sm:$0xff] %vm28_vm15, %v1937_v35 }
  0x1d   :  { %90 = vst.msk [vmem:[#allocation5 + $0x68] sm:$0xff] %vm28_vm15, %v1937_v35  ;;  %91 = vst.msk [vmem:[#allocation5 + $0x70] sm:$0xff] %vm28_vm15, %v1937_v35 }
  0x1e   :  { %683 = vperm.xlu0 %1790, %v641_v21   ;;  %686 = vperm.xlu1 %1791, %v642_v22   ;;  %92 = vst.msk [vmem:[#allocation5 + $0x78] sm:$0xff] %vm28_vm15, %v1937_v35  ;;  %94 = vst.msk [vmem:[#allocation6 + $0x8] sm:$0xff] %vm28_vm15, %v1937_v35  ;;  %v1298_v22 = vld [vmem:[#allocation6] sm:$0xff] }
  0x1f   :  { %95 = vst.msk [vmem:[#allocation6 + $0x10] sm:$0xff] %vm28_vm15, %v1937_v35  ;;  %96 = vst.msk [vmem:[#allocation6 + $0x18] sm:$0xff] %vm28_vm15, %v1937_v35 }
  0x20   :  { %97 = vst.msk [vmem:[#allocation6 + $0x20] sm:$0xff] %vm28_vm15, %v1937_v35  ;;  %98 = vst.msk [vmem:[#allocation6 + $0x28] sm:$0xff] %vm28_vm15, %v1937_v35 }
  0x21   :  { %99 = vst.msk [vmem:[#allocation6 + $0x30] sm:$0xff] %vm28_vm15, %v1937_v35  ;;  %100 = vst.msk [vmem:[#allocation6 + $0x38] sm:$0xff] %vm28_vm15, %v1937_v35 }
  0x22   :  { %689 = vperm.xlu0 %1790, %v643_v24   ;;  %101 = vst.msk [vmem:[#allocation6 + $0x40] sm:$0xff] %vm28_vm15, %v1937_v35  ;;  %102 = vst.msk [vmem:[#allocation6 + $0x48] sm:$0xff] %vm28_vm15, %v1937_v35 }
  0x23   :  { %1748 = vmatpush3.bf16.xpose.msra.mxu0 %v1796_v13  ;;  %1783 = vmatpush3.bf16.xpose.msra.mxu1 %v1796_v13  ;;  %103 = vst.msk [vmem:[#allocation6 + $0x50] sm:$0xff] %vm28_vm15, %v1937_v35  ;;  %104 = vst.msk [vmem:[#allocation6 + $0x58] sm:$0xff] %vm28_vm15, %v1937_v35 }
  0x24   :  { %1749 = vmatprep.subr.bf16.mxu0 %v1797_v18  ;;  %1776 = vmatprep.subr.bf16.mxu1 %v1797_v18  ;;  %105 = vst.msk [vmem:[#allocation6 + $0x60] sm:$0xff] %vm28_vm15, %v1937_v35  ;;  %106 = vst.msk [vmem:[#allocation6 + $0x68] sm:$0xff] %vm28_vm15, %v1937_v35 }
  0x25   :  { %107 = vst.msk [vmem:[#allocation6 + $0x70] sm:$0xff] %vm28_vm15, %v1937_v35  ;;  %108 = vst.msk [vmem:[#allocation6 + $0x78] sm:$0xff] %vm28_vm15, %v1937_v35 }
  0x26   :  { %39 = vst.msk [vmem:[#allocation2 + $0x50] sm:$0xff] %vm28_vm15, %v1938_v0  ;;  %29 = vst.msk [vmem:[#allocation2] sm:$0xff] %vm28_vm15, %v1938_v0 }
  0x27   :  { %30 = vst.msk [vmem:[#allocation2 + $0x8] sm:$0xff] %vm28_vm15, %v1938_v0  ;;  %31 = vst.msk [vmem:[#allocation2 + $0x10] sm:$0xff] %vm28_vm15, %v1938_v0 }
  0x28   :  { %32 = vst.msk [vmem:[#allocation2 + $0x18] sm:$0xff] %vm28_vm15, %v1938_v0  ;;  %33 = vst.msk [vmem:[#allocation2 + $0x20] sm:$0xff] %vm28_vm15, %v1938_v0 }
  0x29   :  { %34 = vst.msk [vmem:[#allocation2 + $0x28] sm:$0xff] %vm28_vm15, %v1938_v0  ;;  %35 = vst.msk [vmem:[#allocation2 + $0x30] sm:$0xff] %vm28_vm15, %v1938_v0 }
  0x2a   :  { %36 = vst.msk [vmem:[#allocation2 + $0x38] sm:$0xff] %vm28_vm15, %v1938_v0  ;;  %37 = vst.msk [vmem:[#allocation2 + $0x40] sm:$0xff] %vm28_vm15, %v1938_v0 }
  0x2b   :  { %1750 = vmatpush3.bf16.xpose.msra.mxu0 %v1797_v18  ;;  %1784 = vmatpush3.bf16.xpose.msra.mxu1 %v1797_v18  ;;  %38 = vst.msk [vmem:[#allocation2 + $0x48] sm:$0xff] %vm28_vm15, %v1938_v0  ;;  %40 = vst.msk [vmem:[#allocation2 + $0x58] sm:$0xff] %vm28_vm15, %v1938_v0 }
  0x2c   :  { %1751 = vmatprep.subr.bf16.mxu0 %v1798_v23  ;;  %1777 = vmatprep.subr.bf16.mxu1 %v1798_v23  ;;  %41 = vst.msk [vmem:[#allocation2 + $0x60] sm:$0xff] %vm28_vm15, %v1938_v0  ;;  %42 = vst.msk [vmem:[#allocation2 + $0x68] sm:$0xff] %vm28_vm15, %v1938_v0 }
  0x2d   :  { %43 = vst.msk [vmem:[#allocation2 + $0x70] sm:$0xff] %vm28_vm15, %v1938_v0  ;;  %44 = vst.msk [vmem:[#allocation2 + $0x78] sm:$0xff] %vm28_vm15, %v1938_v0  ;;  %v1305_v0 = vld [vmem:[#allocation6 + $0x38] sm:$0xff] }
  0x33   :  { %1752 = vmatpush3.bf16.xpose.msra.mxu0 %v1798_v23  ;;  %1785 = vmatpush3.bf16.xpose.msra.mxu1 %v1798_v23 }
  0x34   :  { %1753 = vmatprep.subr.bf16.mxu0 %v1799_v25  ;;  %1778 = vmatprep.subr.bf16.mxu1 %v1799_v25 }
  0x3b   :  { %1754 = vmatpush3.bf16.xpose.msra.mxu0 %v1799_v25  ;;  %1786 = vmatpush3.bf16.xpose.msra.mxu1 %v1799_v25 }
  0x42   :  { %1756 = vmatmul.mubr.bf16.vlgmr.msra.gmra.mxu0 %v1802_v26  ;;  %1764 = vmatmul.mubr.bf16.vlgmr.msra.gmra.mxu1 %v1803_v27  ;;  %v1300_v27 = vld [vmem:[#allocation6 + $0x10] sm:$0xff] }
  0x43   :  { %1759 = vmatprep.mubr.bf16.mxu0 %v1804_v28  ;;  %1767 = vmatprep.mubr.bf16.mxu1 %v1805_v29  ;;  %v1299_v28 = vld [vmem:[#allocation6 + $0x8] sm:$0xff] }
  0x4a   :  { %1760 = vmatmul.mubr.bf16.gmra.mxu0 %v1806_v30  ;;  %1768 = vmatmul.mubr.bf16.gmra.mxu1 %v1807_v31 }
  0x81   :  { %v2072_v33 = vpop.permute.xlu0 %647  ;;  %v2074_v34 = vpop.permute.xlu1 %653 }
  0x82   :  { %vm698_vm0 = vcmp.eq.s32.totalorder %v2072_v33, %v2070_v32  ;;  %vm700_vm1 = vcmp.eq.s32.totalorder %v2074_v34, %v2070_v32 }
  0x83   :  { %v1707_v36 = vsel %vm698_vm0, 1.0, %v1937_v35  ;;  %v1709_v38 = vsel %vm700_vm1, 1.0, %v1937_v35 }
  0x84   :  { %1346 = vadd.xlane.f32.xlu1 %v1707_v36 }
  0x85   :  { %v2084_v37 = vpop.permute.xlu0 %650  ;;  %v2090_v39 = vpop.permute.xlu1 %656 }
  0x86   :  { %vm699_vm2 = vcmp.eq.s32.totalorder %v2084_v37, %v2070_v32  ;;  %vm701_vm3 = vcmp.eq.s32.totalorder %v2090_v39, %v2070_v32 }
  0x87   :  { %v1708_v40 = vsel %vm699_vm2, 1.0, %v1937_v35  ;;  %v1710_v42 = vsel %vm701_vm3, 1.0, %v1937_v35 }
  0x88   :  { %1350 = vadd.xlane.f32.xlu1 %v1709_v38  ;;  %1348 = vadd.xlane.f32.xlu0 %v1708_v40  ;;  %v1302_v40 = vld [vmem:[#allocation6 + $0x20] sm:$0xff] }
  0x89   :  { %v2100_v41 = vpop.permute.xlu0 %659  ;;  %v2106_v43 = vpop.permute.xlu1 %662 }
  0x8a   :  { %vm3116_vm4 = vcmp.eq.s32.totalorder %v2100_v41, %v2070_v32  ;;  %vm703_vm5 = vcmp.eq.s32.totalorder %v2106_v43, %v2070_v32 }
  0x8b   :  { %v1711_v44 = vsel %vm3116_vm4, 1.0, %v1937_v35  ;;  %v1712_v46 = vsel %vm703_vm5, 1.0, %v1937_v35 }
  0x8c   :  { %1354 = vadd.xlane.f32.xlu1 %v1711_v44  ;;  %1352 = vadd.xlane.f32.xlu0 %v1710_v42  ;;  %v1301_v42 = vld [vmem:[#allocation6 + $0x18] sm:$0xff] }
  0x8d   :  { %v2116_v45 = vpop.permute.xlu0 %665  ;;  %v2122_v47 = vpop.permute.xlu1 %668 }
  0x8e   :  { %vm3114_vm6 = vcmp.eq.s32.totalorder %v2116_v45, %v2070_v32  ;;  %vm705_vm7 = vcmp.eq.s32.totalorder %v2122_v47, %v2070_v32 }
  0x8f   :  { %v1713_v48 = vsel %vm3114_vm6, 1.0, %v1937_v35  ;;  %v1714_v50 = vsel %vm705_vm7, 1.0, %v1937_v35 }
  0x90   :  { %1358 = vadd.xlane.f32.xlu1 %v1713_v48  ;;  %1356 = vadd.xlane.f32.xlu0 %v1712_v46 }
  0x91   :  { %v2132_v49 = vpop.permute.xlu0 %671  ;;  %v2138_v51 = vpop.permute.xlu1 %674 }
  0x92   :  { %vm3112_vm8 = vcmp.eq.s32.totalorder %v2132_v49, %v2070_v32  ;;  %vm707_vm9 = vcmp.eq.s32.totalorder %v2138_v51, %v2070_v32 }
  0x93   :  { %v1715_v52 = vsel %vm3112_vm8, 1.0, %v1937_v35  ;;  %v1716_v54 = vsel %vm707_vm9, 1.0, %v1937_v35 }
  0x94   :  { %1362 = vadd.xlane.f32.xlu1 %v1715_v52  ;;  %1360 = vadd.xlane.f32.xlu0 %v1714_v50  ;;  %v1304_v52 = vld [vmem:[#allocation6 + $0x30] sm:$0xff] }
  0x95   :  { %v2148_v53 = vpop.permute.xlu0 %677  ;;  %v2154_v55 = vpop.permute.xlu1 %680 }
  0x96   :  { %vm3111_vm10 = vcmp.eq.s32.totalorder %v2148_v53, %v2070_v32  ;;  %vm709_vm11 = vcmp.eq.s32.totalorder %v2154_v55, %v2070_v32 }
  0x97   :  { %v1717_v56 = vsel %vm3111_vm10, 1.0, %v1937_v35  ;;  %v1718_v58 = vsel %vm709_vm11, 1.0, %v1937_v35 }
  0x98   :  { %1366 = vadd.xlane.f32.xlu1 %v1717_v56  ;;  %1364 = vadd.xlane.f32.xlu0 %v1716_v54  ;;  %v1303_v54 = vld [vmem:[#allocation6 + $0x28] sm:$0xff] }
  0x99   :  { %v2164_v57 = vpop.permute.xlu0 %683  ;;  %v2170_v59 = vpop.permute.xlu1 %686 }
  0x9a   :  { %vm3107_vm12 = vcmp.eq.s32.totalorder %v2164_v57, %v2070_v32  ;;  %vm711_vm13 = vcmp.eq.s32.totalorder %v2170_v59, %v2070_v32 }
  0x9b   :  { %v1719_v60 = vsel %vm3107_vm12, 1.0, %v1937_v35  ;;  %v1720_v62 = vsel %vm711_vm13, 1.0, %v1937_v35 }
  0x9c   :  { %1370 = vadd.xlane.f32.xlu1 %v1719_v60  ;;  %1368 = vadd.xlane.f32.xlu0 %v1718_v58 }
  0x9d   :  { %v2180_v61 = vpop.permute.xlu0 %689 }
  0x9e   :  { %vm3106_vm14 = vcmp.eq.s32.totalorder %v2180_v61, %v2070_v32 }
  0x9f   :  { %v1721_v63 = vsel %vm3106_vm14, 1.0, %v1937_v35 }
  0xa0   :  { %1374 = vadd.xlane.f32.xlu1 %v1721_v63  ;;  %1372 = vadd.xlane.f32.xlu0 %v1720_v62  ;;  %v1306_v63 = vld [vmem:[#allocation6 + $0x40] sm:$0xff] }
 0x102   :  { %v1757_v1 = vpop.f32.mrf.mxu0  ;;  %v1765_v2 = vpop.f32.mrf.mxu1 }
 0x103   :  { %v2336_v3 = vmul.f32 0.4, %v1757_v1  ;;  %v2338_v4 = vmul.f32 0.4, %v1765_v2 }
 0x104   :  { %v271_v5 = vpop.f32.mrf.mxu0  ;;  %v303_v6 = vpop.f32.mrf.mxu1 }
 0x105   :  { %750 = vmax.xlane.f32.xlu1 %v2338_v4  ;;  %734 = vmax.xlane.f32.xlu0 %v2336_v3  ;;  %v2342_v8 = vmul.f32 0.4, %v271_v5  ;;  %v2344_v9 = vmul.f32 0.4, %v303_v6 }
 0x106   :  { %v1758_v7 = vpop.f32.mrf.mxu0  ;;  %v1766_v10 = vpop.f32.mrf.mxu1 }
 0x107   :  { %v2348_v12 = vmul.f32 0.4, %v1758_v7  ;;  %v2354_v16 = vmul.f32 0.4, %v1766_v10  ;;  %v1308_v7 = vld [vmem:[#allocation6 + $0x50] sm:$0xff]  ;;  %v1307_v10 = vld [vmem:[#allocation6 + $0x48] sm:$0xff] }
 0x108   :  { %v274_v11 = vpop.f32.mrf.mxu0  ;;  %v306_v14 = vpop.f32.mrf.mxu1 }
 0x109   :  { %746 = vmax.xlane.f32.xlu1 %v2344_v9  ;;  %730 = vmax.xlane.f32.xlu0 %v2342_v8  ;;  %v2350_v13 = vmul.f32 0.4, %v274_v11  ;;  %v2360_v19 = vmul.f32 0.4, %v306_v14  ;;  %v644_v11 = vld [vmem:[%s3101_s2 + $0x78] sm:$0xff] }
 0x10a   :  { %v1761_v15 = vpop.f32.mrf.mxu0  ;;  %v1769_v18 = vpop.f32.mrf.mxu1 }
 0x10b   :  { %v2356_v17 = vmul.f32 0.4, %v1761_v15  ;;  %v2362_v20 = vmul.f32 0.4, %v1769_v18 }
 0x10c   :  { %v287_v21 = vpop.f32.mrf.mxu0  ;;  %v319_v24 = vpop.f32.mrf.mxu1 }
 0x10d   :  { %736 = vmax.xlane.f32.xlu0 %v2348_v12  ;;  %732 = vmax.xlane.f32.xlu1 %v2350_v13  ;;  %v2366_v23 = vmul.f32 0.4, %v287_v21  ;;  %v1347_v25 = vpop.xlane.xlu1 %1346  ;;  %v2369_v29 = vmul.f32 0.4, %v319_v24  ;;  %v1309_v24 = vld [vmem:[#allocation6 + $0x58] sm:$0xff] }
 0x10e   :  { %v1378_v26 = vadd.f32 %v1347_v25, %v1298_v22  ;;  %v1310_v22 = vld [vmem:[#allocation6 + $0x60] sm:$0xff] }
 0x110   :  { %1394 = vst.msk [vmem:[#allocation6] sm:$0xff] %vm28_vm15, %v1378_v26 }
 0x111   :  { %752 = vmax.xlane.f32.xlu0 %v2354_v16  ;;  %742 = vmax.xlane.f32.xlu1 %v2356_v17  ;;  %v1351_v30 = vpop.xlane.xlu1 %1350  ;;  %v1349_v31 = vpop.xlane.xlu0 %1348 }
 0x112   :  { %v1380_v36 = vadd.f32 %v1351_v30, %v1300_v27  ;;  %v1379_v38 = vadd.f32 %v1349_v31, %v1299_v28  ;;  %v1312_v30 = vld [vmem:[#allocation6 + $0x70] sm:$0xff]  ;;  %v1311_v31 = vld [vmem:[#allocation6 + $0x68] sm:$0xff] }
 0x114   :  { %1396 = vst.msk [vmem:[#allocation6 + $0x10] sm:$0xff] %vm28_vm15, %v1380_v36  ;;  %1395 = vst.msk [vmem:[#allocation6 + $0x8] sm:$0xff] %vm28_vm15, %v1379_v38 }
 0x115   :  { %748 = vmax.xlane.f32.xlu0 %v2360_v19  ;;  %758 = vmax.xlane.f32.xlu1 %v2362_v20  ;;  %v1355_v44 = vpop.xlane.xlu1 %1354  ;;  %v1353_v46 = vpop.xlane.xlu0 %1352 }
 0x116   :  { %v1382_v48 = vadd.f32 %v1355_v44, %v1302_v40  ;;  %v1381_v50 = vadd.f32 %v1353_v46, %v1301_v42  ;;  %v2390_v44 = vld [vmem:[#allocation2 + $0x50] sm:$0xff] }
 0x117   :  { %3135 = vst [vmem:[#allocation7_spill] sm:$0xff] %v2390_v44  ;;  %v2392_v46 = vld [vmem:[#allocation2 + $0x10] sm:$0xff] }
 0x118   :  { %1398 = vst.msk [vmem:[#allocation6 + $0x20] sm:$0xff] %vm28_vm15, %v1382_v48  ;;  %1397 = vst.msk [vmem:[#allocation6 + $0x18] sm:$0xff] %vm28_vm15, %v1381_v50 }
 0x119   :  { %738 = vmax.xlane.f32.xlu1 %v2366_v23  ;;  %v1359_v56 = vpop.xlane.xlu1 %1358  ;;  %v1357_v58 = vpop.xlane.xlu0 %1356 }
 0x11a   :  { %v1384_v60 = vadd.f32 %v1359_v56, %v1304_v52  ;;  %v1383_v62 = vadd.f32 %v1357_v58, %v1303_v54  ;;  %v2400_v56 = vld [vmem:[#allocation2 + $0x40] sm:$0xff] }
 0x11b   :  { %3137 = vst [vmem:[#allocation9_spill] sm:$0xff] %v2400_v56  ;;  %v2402_v58 = vld [vmem:[#allocation2] sm:$0xff] }
 0x11c   :  { %1400 = vst.msk [vmem:[#allocation6 + $0x30] sm:$0xff] %vm28_vm15, %v1384_v60  ;;  %1399 = vst.msk [vmem:[#allocation6 + $0x28] sm:$0xff] %vm28_vm15, %v1383_v62 }
 0x11d   :  { %754 = vmax.xlane.f32.xlu1 %v2369_v29  ;;  %v1363_v1 = vpop.xlane.xlu1 %1362  ;;  %v1361_v2 = vpop.xlane.xlu0 %1360 }
 0x11e   :  { %v1386_v5 = vadd.f32 %v1363_v1, %v1306_v63  ;;  %v1385_v6 = vadd.f32 %v1361_v2, %v1305_v0  ;;  %v2417_v2 = vld [vmem:[#allocation2 + $0x18] sm:$0xff] }
 0x120   :  { %1402 = vst.msk [vmem:[#allocation6 + $0x40] sm:$0xff] %vm28_vm15, %v1386_v5  ;;  %1401 = vst.msk [vmem:[#allocation6 + $0x38] sm:$0xff] %vm28_vm15, %v1385_v6  ;;  %v2419_v5 = vld [vmem:[#allocation2 + $0x8] sm:$0xff] }
 0x121   :  { %v1367_v14 = vpop.xlane.xlu1 %1366  ;;  %v1365_v15 = vpop.xlane.xlu0 %1364  ;;  %3139 = vst [vmem:[#allocation11_spill] sm:$0xff] %v2419_v5 }
 0x122   :  { %v1388_v18 = vadd.f32 %v1367_v14, %v1308_v7  ;;  %v1387_v21 = vadd.f32 %v1365_v15, %v1307_v10  ;;  %v2434_v15 = vld [vmem:[#allocation2 + $0x58] sm:$0xff] }
 0x124   :  { %1404 = vst.msk [vmem:[#allocation6 + $0x50] sm:$0xff] %vm28_vm15, %v1388_v18  ;;  %1403 = vst.msk [vmem:[#allocation6 + $0x48] sm:$0xff] %vm28_vm15, %v1387_v21  ;;  %v2436_v18 = vld [vmem:[#allocation2 + $0x30] sm:$0xff] }
 0x125   :  { %v1371_v25 = vpop.xlane.xlu1 %1370  ;;  %v1369_v26 = vpop.xlane.xlu0 %1368  ;;  %3141 = vst [vmem:[#allocation13_spill] sm:$0xff] %v2436_v18 }
 0x126   :  { %v1390_v27 = vadd.f32 %v1371_v25, %v1310_v22  ;;  %v1389_v28 = vadd.f32 %v1369_v26, %v1309_v24 }
 0x128   :  { %1406 = vst.msk [vmem:[#allocation6 + $0x60] sm:$0xff] %vm28_vm15, %v1390_v27  ;;  %1405 = vst.msk [vmem:[#allocation6 + $0x58] sm:$0xff] %vm28_vm15, %v1389_v28  ;;  %v2451_v27 = vld [vmem:[#allocation2 + $0x48] sm:$0xff]  ;;  %v2453_v28 = vld [vmem:[#allocation2 + $0x70] sm:$0xff] }
 0x129   :  { %v1375_v36 = vpop.xlane.xlu1 %1374  ;;  %v1373_v38 = vpop.xlane.xlu0 %1372  ;;  %3143 = vst [vmem:[#allocation15_spill] sm:$0xff] %v2453_v28 }
 0x12a   :  { %v1392_v40 = vadd.f32 %v1375_v36, %v1312_v30  ;;  %v1391_v42 = vadd.f32 %v1373_v38, %v1311_v31 }
 0x12c   :  { %1408 = vst.msk [vmem:[#allocation6 + $0x70] sm:$0xff] %vm28_vm15, %v1392_v40  ;;  %1407 = vst.msk [vmem:[#allocation6 + $0x68] sm:$0xff] %vm28_vm15, %v1391_v42  ;;  %v2468_v42 = vld [vmem:[#allocation2 + $0x20] sm:$0xff] }
 0x12d   :  { %3145 = vst [vmem:[#allocation17_spill] sm:$0xff] %v2468_v42 }
 0x12e   :  { %692 = vperm.xlu1 %1791, %v644_v11  }
 0x18e   :  { %v751_v48 = vpop.xlane.xlu1 %750  ;;  %v735_v50 = vpop.xlane.xlu0 %734 }
 0x18f   :  { %v2395_v52 = vmax.f32 %v2390_v44, %v751_v48  ;;  %v2398_v54 = vmax.f32 %v2392_v46, %v735_v50 }
 0x191   :  { %3136 = vst [vmem:[#allocation8_spill] sm:$0xff] %v2395_v52  ;;  %1077 = vst.msk [vmem:[#allocation2 + $0x50] sm:$0xff] %vm28_vm15, %v2395_v52  ;;  %790 = vperm.xlu1 %1791, %v2398_v54  }
 0x192   :  { %1069 = vst.msk [vmem:[#allocation2 + $0x10] sm:$0xff] %vm28_vm15, %v2398_v54  ;;  %v747_v62 = vpop.xlane.xlu1 %746  ;;  %v731_v63 = vpop.xlane.xlu0 %730 }
 0x193   :  { %v2412_v0 = vmax.f32 %v2400_v56, %v747_v62  ;;  %v2415_v1 = vmax.f32 %v2402_v58, %v731_v63  ;;  %v2480_v63 = vld [vmem:[#allocation2 + $0x60] sm:$0xff] }
 0x194   :  { %3147 = vst [vmem:[#allocation19_spill] sm:$0xff] %v2480_v63 }
 0x195   :  { %3138 = vst [vmem:[#allocation10_spill] sm:$0xff] %v2412_v0  ;;  %1075 = vst.msk [vmem:[#allocation2 + $0x40] sm:$0xff] %vm28_vm15, %v2412_v0  ;;  %780 = vperm.xlu1 %1791, %v2415_v1  }
 0x196   :  { %1067 = vst.msk [vmem:[#allocation2] sm:$0xff] %vm28_vm15, %v2415_v1  ;;  %v737_v7 = vpop.xlane.xlu0 %736  ;;  %v733_v10 = vpop.xlane.xlu1 %732 }
 0x197   :  { %v2429_v11 = vmax.f32 %v2417_v2, %v737_v7  ;;  %v2432_v14 = vmax.f32 %v2419_v5, %v733_v10 }
 0x199   :  { %3140 = vst [vmem:[#allocation12_spill] sm:$0xff] %v2432_v14  ;;  %1070 = vst.msk [vmem:[#allocation2 + $0x18] sm:$0xff] %vm28_vm15, %v2429_v11  ;;  %795 = vperm.xlu1 %1791, %v2429_v11  }
 0x19a   :  { %1068 = vst.msk [vmem:[#allocation2 + $0x8] sm:$0xff] %vm28_vm15, %v2432_v14  ;;  %v753_v22 = vpop.xlane.xlu0 %752  ;;  %v743_v24 = vpop.xlane.xlu1 %742 }
 0x19b   :  { %v2446_v25 = vmax.f32 %v2434_v15, %v753_v22  ;;  %v2449_v26 = vmax.f32 %v2436_v18, %v743_v24  ;;  %v1762_v24 = vpop.f32.mrf.mxu0 }
 0x19d   :  { %3142 = vst [vmem:[#allocation14_spill] sm:$0xff] %v2449_v26  ;;  %1078 = vst.msk [vmem:[#allocation2 + $0x58] sm:$0xff] %vm28_vm15, %v2446_v25  ;;  %835 = vperm.xlu1 %1791, %v2446_v25   ;;  %v290_v48 = vpop.f32.mrf.mxu0 }
 0x19e   :  { %1073 = vst.msk [vmem:[#allocation2 + $0x30] sm:$0xff] %vm28_vm15, %v2449_v26  ;;  %v749_v31 = vpop.xlane.xlu0 %748  ;;  %v759_v36 = vpop.xlane.xlu1 %758  ;;  %v2503_v30 = vmul.f32 0.4, %v290_v48 }
 0x19f   :  { %v2463_v38 = vmax.f32 %v2451_v27, %v749_v31  ;;  %v2466_v40 = vmax.f32 %v2453_v28, %v759_v36  ;;  %v2497_v36 = vmul.f32 0.4, %v1762_v24 }
 0x1a1   :  { %3144 = vst [vmem:[#allocation16_spill] sm:$0xff] %v2466_v40  ;;  %1076 = vst.msk [vmem:[#allocation2 + $0x48] sm:$0xff] %vm28_vm15, %v2463_v38  ;;  %825 = vperm.xlu1 %1791, %v2463_v38  }
 0x1a2   :  { %1081 = vst.msk [vmem:[#allocation2 + $0x70] sm:$0xff] %vm28_vm15, %v2466_v40  ;;  %v739_v50 = vpop.xlane.xlu1 %738 }
 0x1a3   :  { %v2478_v62 = vmax.f32 %v2468_v42, %v739_v50  ;;  %v1770_v50 = vpop.f32.mrf.mxu1 }
 0x1a5   :  { %3146 = vst [vmem:[#allocation18_spill] sm:$0xff] %v2478_v62  ;;  %1071 = vst.msk [vmem:[#allocation2 + $0x20] sm:$0xff] %vm28_vm15, %v2478_v62  ;;  %v322_v21 = vpop.f32.mrf.mxu1 }
 0x1a6   :  { %v755_v7 = vpop.xlane.xlu1 %754  ;;  %v2506_v6 = vmul.f32 0.4, %v322_v21 }
 0x1a7   :  { %v2485_v10 = vmax.f32 %v2480_v63, %v755_v7  ;;  %v2500_v7 = vmul.f32 0.4, %v1770_v50 }
 0x1a9   :  { %3148 = vst [vmem:[#allocation20_spill] sm:$0xff] %v2485_v10  ;;  %1079 = vst.msk [vmem:[#allocation2 + $0x60] sm:$0xff] %vm28_vm15, %v2485_v10 }
 0x1aa   :  { %v2489_v22 = vpop.permute.xlu1 %692 }
 0x1ab   :  { %vm713_vm14 = vcmp.eq.s32.totalorder %v2489_v22, %v2070_v32 }
 0x1ac   :  { %v1722_v31 = vsel %vm713_vm14, 1.0, %v1937_v35  ;;  %v351_v35 = vlaneseq }
 0x1ad   :  { %1376 = vadd.xlane.f32.xlu0 %v1722_v31 }
 0x1ae   :  { %v2516_v48 = vshrl.u32 %v351_v35, 7  ;;  %v2519_v24 = vand.u32 127, %v351_v35  ;;  %v2539_v35 = vld [vmem:[%s3103_s5] ss:$0 sm:$0xff] }
 0x1b0   :  { %v353_v21 = vadd.s32 8, %v2516_v48  ;;  %v2522_v50 = vand.u32 7, %v2519_v24  ;;  %v355_v60 = vadd.s32 24, %v2516_v48  ;;  %v361_v28 = vadd.s32 72, %v2516_v48 }
 0x1b1   :  { %744 = vmax.xlane.f32.xlu0 %v2497_v36 }
 0x1b2   :  { %v401_v31 = vand.u32 7, %v353_v21  ;;  %v415_v42 = vand.u32 7, %v355_v60  ;;  %v359_v60 = vadd.s32 56, %v2516_v48 }
 0x1b4   :  { %vm2526_vm12 = vcmp.ne.s32.totalorder %v401_v31, %v2522_v50  ;;  %vm2542_vm8 = vcmp.ne.s32.totalorder %v415_v42, %v2522_v50  ;;  %v443_v42 = vand.u32 7, %v359_v60 }
 0x1b5   :  { %760 = vmax.xlane.f32.xlu0 %v2500_v7  ;;  %vm1084_vm10 = vmand %vm699_vm2, %vm2526_vm12 }
 0x1b6   :  { %vm1086_vm2 = vmand %vm701_vm3, %vm2542_vm8  ;;  %vm2566_vm4 = vcmp.ne.s32.totalorder %v443_v42, %v2522_v50 }
 0x1b7   :  { %vm1090_vm3 = vmand %vm705_vm7, %vm2566_vm4 }
 0x1b9   :  { %740 = vmax.xlane.f32.xlu0 %v2503_v30 }
 0x1bd   :  { %756 = vmax.xlane.f32.xlu0 %v2506_v6 }
 0x1d3   :  { %830 = vperm.xlu0 %1790, %v2395_v52  }
 0x1d7   :  { %820 = vperm.xlu0 %1790, %v2412_v0  }
 0x1db   :  { %785 = vperm.xlu0 %1790, %v2432_v14  }
 0x1df   :  { %810 = vperm.xlu0 %1790, %v2449_v26   ;;  %v2584_v26 = vsel %vm1090_vm3, %v2539_v35, 0.0 }
 0x1e0   :  { %v1145_v37 = vmul.f32 %v2584_v26, %v2497_v36 }
 0x1e3   :  { %850 = vperm.xlu0 %1790, %v2466_v40   ;;  %v363_v40 = vadd.s32 88, %v2516_v48 }
 0x1e5   :  { %v471_v42 = vand.u32 7, %v363_v40  ;;  %v367_v40 = vadd.s32 120, %v2516_v48 }
 0x1e7   :  { %800 = vperm.xlu0 %1790, %v2478_v62   ;;  %v1107_v62 = vsel %vm1084_vm10, %v2539_v35, 0.0  ;;  %vm2593_vm7 = vcmp.ne.s32.totalorder %v471_v42, %v2522_v50  ;;  %v499_v42 = vand.u32 7, %v367_v40 }
 0x1e9   :  { %vm2623_vm3 = vcmp.ne.s32.totalorder %v499_v42, %v2522_v50 }
 0x1eb   :  { %840 = vperm.xlu0 %1790, %v2485_v10   ;;  %v357_v10 = vadd.s32 40, %v2516_v48 }
 0x1ed   :  { %v429_v31 = vand.u32 7, %v357_v10  ;;  %v1109_v10 = vsel %vm1086_vm2, %v2539_v35, 0.0 }
 0x1ef   :  { %vm2554_vm6 = vcmp.ne.s32.totalorder %v429_v31, %v2522_v50  ;;  %v457_v31 = vand.u32 7, %v361_v28  ;;  %v365_v28 = vadd.s32 104, %v2516_v48 }
 0x1f0   :  { %vm1088_vm10 = vmand %vm703_vm5, %vm2554_vm6 }
 0x1f1   :  { %v1111_v60 = vsel %vm1088_vm10, %v2539_v35, 0.0  ;;  %vm2578_vm5 = vcmp.ne.s32.totalorder %v457_v31, %v2522_v50  ;;  %v485_v31 = vand.u32 7, %v365_v28 }
 0x1f2   :  { %vm1092_vm2 = vmand %vm707_vm9, %vm2578_vm5 }
 0x1f3   :  { %v2599_v14 = vsel %vm1092_vm2, %v2539_v35, 0.0  ;;  %vm1094_vm9 = vmand %vm709_vm11, %vm2593_vm7  ;;  %vm2608_vm10 = vcmp.ne.s32.totalorder %v485_v31, %v2522_v50 }
 0x1f4   :  { %3161 = vst [vmem:[#allocation21_spill] sm:$0xff] %v2599_v14  ;;  %v2614_v56 = vsel %vm1094_vm9, %v2539_v35, 0.0  ;;  %vm1096_vm11 = vmand %vm711_vm13, %vm2608_vm10  ;;  %vm610_vm13 = vcmp.lt.s32.totalorder %v2519_v24, 16  ;;  %v1416_v24 = vld [vmem:[#allocation2 + $0x18] sm:$0xff] }
 0x1f5   :  { %3164 = vst [vmem:[#allocation22_spill] sm:$0xff] %v2614_v56  ;;  %v2629_v40 = vsel %vm1096_vm11, %v2539_v35, 0.0  ;;  %vm1098_vm2 = vmand %vm713_vm14, %vm2623_vm3 }
 0x1f6   :  { %3167 = vst [vmem:[#allocation23_spill] sm:$0xff] %v2629_v40 }
 0x1fc   :  { %v3202_v51 = vld [vmem:[#allocation22_spill] sm:$0xff] }
 0x20a   :  { %1236 = vadd.xlane.f32.xlu0 %v1107_v62 }
 0x20c   :  { %v791_v18 = vpop.permute.xlu1 %790 }
 0x20d   :  { %v860_v28 = vsub.f32 %v2336_v3, %v791_v18 }
 0x20e   :  { %1240 = vadd.xlane.f32.xlu0 %v1109_v10 }
 0x20f   :  { %v878_v31 = vmul.f32 1.442695, %v860_v28  ;;  %v2639_v28 = vsel %vm1098_vm2, %v2539_v35, 0.0 }
 0x210   :  { %v781_v5 = vpop.permute.xlu1 %780 }
 0x211   :  { %v858_v18 = vsub.f32 %v2342_v8, %v781_v5  ;;  %1808 = vpow2.f32 %v878_v31  ;;  %v1139_v5 = vmul.f32 %v1107_v62, %v2350_v13  ;;  %v1141_v31 = vmul.f32 %v1109_v10, %v2348_v12 }
 0x212   :  { %1244 = vadd.xlane.f32.xlu0 %v1111_v60  ;;  %v1143_v62 = vmul.f32 %v1111_v60, %v2503_v30  ;;  %v3197_v10 = vsub.f32 %v2402_v58, %v2415_v1  ;;  %v1125_v1 = vld [vmem:[#allocation4 + $0x18] sm:$0xff] }
 0x213   :  { %v874_v42 = vmul.f32 1.442695, %v858_v18 }
 0x214   :  { %v796_v0 = vpop.permute.xlu1 %795 }
 0x215   :  { %v861_v44 = vsub.f32 %v2348_v12, %v796_v0  ;;  %1810 = vpow2.f32 %v874_v42  ;;  %v394_v42 = vand.u32 7, %v2516_v48 }
 0x216   :  { %1248 = vadd.xlane.f32.xlu0 %v2584_v26 }
 0x217   :  { %v880_v52 = vmul.f32 1.442695, %v861_v44  ;;  %vm2660_vm11 = vcmp.ne.s32.totalorder %v394_v42, %v2522_v50 }
 0x218   :  { %v836_v59 = vpop.permute.xlu1 %835  ;;  %vm613_vm2 = vmand %vm2660_vm11, %vm610_vm13 }
 0x219   :  { %1812 = vpow2.f32 %v880_v52  ;;  %v1313_v52 = vld [vmem:[#allocation6 + $0x78] sm:$0xff] }
 0x21a   :  { %1252 = vadd.xlane.f32.xlu0 %v2599_v14 }
 0x21c   :  { %v826_v22 = vpop.permute.xlu1 %825 }
 0x21d   :  { %v867_v0 = vsub.f32 %v2360_v19, %v826_v22 }
 0x21e   :  { %1256 = vadd.xlane.f32.xlu0 %v2614_v56  ;;  %v354_v56 = vadd.s32 16, %v2516_v48  ;;  %v1809_v12 = vpop.eup %1808 }
 0x21f   :  { %v892_v44 = vmul.f32 1.442695, %v867_v0 }
 0x220   :  { %v408_v14 = vand.u32 7, %v354_v56 }
 0x222   :  { %1260 = vadd.xlane.f32.xlu0 %v2629_v40  ;;  %v869_v40 = vsub.f32 %v2354_v16, %v836_v59  ;;  %vm2650_vm14 = vcmp.ne.s32.totalorder %v408_v14, %v2522_v50  ;;  %v1811_v14 = vpop.eup %1810 }
 0x223   :  { %vm615_vm9 = vmand %vm2650_vm14, %vm610_vm13  ;;  %v906_v22 = vsel %vm613_vm2, %v1811_v14, 0.0  ;;  %v364_v14 = vadd.s32 96, %v2516_v48 }
 0x224   :  { %v896_v18 = vmul.f32 1.442695, %v869_v40  ;;  %v908_v56 = vsel %vm615_vm9, %v1809_v12, 0.0  ;;  %vm616_vm9 = vmand %vm2542_vm8, %vm610_vm13 }
 0x225   :  { %vm624_vm8 = vmand %vm2593_vm7, %vm610_vm13 }
 0x226   :  { %1264 = vadd.xlane.f32.xlu0 %v2639_v28  ;;  %1814 = vpow2.f32 %v896_v18  ;;  %vm622_vm7 = vmand %vm2578_vm5, %vm610_vm13 }
 0x227   :  { %1816 = vpow2.f32 %v892_v44  ;;  %vm1083_vm5 = vmand %vm698_vm0, %vm2660_vm11  ;;  %vm3180_vm0 = vcmp.eq.s32.totalorder %v2100_v41, %v2070_v32 }
 0x228   :  { %vm1085_vm2 = vmand %vm700_vm1, %vm2650_vm14  ;;  %vm3183_vm14 = vcmp.eq.s32.totalorder %v2116_v45, %v2070_v32 }
 0x229   :  { %v1108_v43 = vsel %vm1085_vm2, %v2539_v35, 0.0 }
 0x22a   :  { %1156 = vadd.xlane.f32.xlu0 %v1139_v5  ;;  %v2668_v5 = vld [vmem:[#allocation2 + $0x38] sm:$0xff] }
 0x22e   :  { %1160 = vadd.xlane.f32.xlu0 %v1141_v31  ;;  %v1813_v31 = vpop.eup %1812 }
 0x22f   :  { %v909_v42 = vsel %vm616_vm9, %v1813_v31, 0.0  ;;  %v2706_v31 = vld [vmem:[#allocation2 + $0x68] sm:$0xff] }
 0x230   :  { %3176 = vst [vmem:[#allocation28_spill] sm:$0xff] %v2706_v31 }
 0x232   :  { %1164 = vadd.xlane.f32.xlu0 %v1143_v62  ;;  %v2678_v62 = vld [vmem:[#allocation2 + $0x78] sm:$0xff] }
 0x233   :  { %3172 = vst [vmem:[#allocation24_spill] sm:$0xff] %v2678_v62  ;;  %v1815_v12 = vpop.eup %1814 }
 0x236   :  { %v1377_v60 = vpop.xlane.xlu0 %1376  ;;  %1006 = vadd.xlane.f32.xlu0 %v908_v56  ;;  %v2692_v56 = vld [vmem:[#allocation2 + $0x28] sm:$0xff] }
 0x237   :  { %v1393_v40 = vadd.f32 %v1377_v60, %v1313_v52  ;;  %3174 = vst [vmem:[#allocation26_spill] sm:$0xff] %v2692_v56  ;;  %v917_v60 = vsel %vm624_vm8, %v1815_v12, 0.0 }
 0x239   :  { %1409 = vst.msk [vmem:[#allocation6 + $0x78] sm:$0xff] %vm28_vm15, %v1393_v40  ;;  %v1817_v40 = vpop.eup %1816 }
 0x23a   :  { %v745_v18 = vpop.xlane.xlu0 %744  ;;  %1002 = vadd.xlane.f32.xlu0 %v906_v22 }
 0x23b   :  { %v2676_v0 = vmax.f32 %v2668_v5, %v745_v18 }
 0x23d   :  { %1074 = vst.msk [vmem:[#allocation2 + $0x38] sm:$0xff] %vm28_vm15, %v2676_v0  ;;  %815 = vperm.xlu1 %1791, %v2676_v0  }
 0x23e   :  { %v761_v52 = vpop.xlane.xlu0 %760  ;;  %1008 = vadd.xlane.f32.xlu0 %v909_v42  ;;  %v915_v42 = vsel %vm622_vm7, %v1817_v40, 0.0 }
 0x23f   :  { %v2690_v21 = vmax.f32 %v2678_v62, %v761_v52 }
 0x241   :  { %3173 = vst [vmem:[#allocation25_spill] sm:$0xff] %v2690_v21  ;;  %1082 = vst.msk [vmem:[#allocation2 + $0x78] sm:$0xff] %vm28_vm15, %v2690_v21  ;;  %855 = vperm.xlu1 %1791, %v2690_v21  }
 0x242   :  { %v741_v22 = vpop.xlane.xlu0 %740  ;;  %1024 = vadd.xlane.f32.xlu0 %v917_v60  ;;  %v356_v60 = vadd.s32 32, %v2516_v48 }
 0x243   :  { %v2704_v47 = vmax.f32 %v2692_v56, %v741_v22  ;;  %v358_v22 = vadd.s32 48, %v2516_v48 }
 0x244   :  { %v422_v40 = vand.u32 7, %v356_v60  ;;  %v360_v60 = vadd.s32 64, %v2516_v48 }
 0x245   :  { %3175 = vst [vmem:[#allocation27_spill] sm:$0xff] %v2704_v47  ;;  %1072 = vst.msk [vmem:[#allocation2 + $0x28] sm:$0xff] %vm28_vm15, %v2704_v47  ;;  %805 = vperm.xlu1 %1791, %v2704_v47   ;;  %v436_v33 = vand.u32 7, %v358_v22 }
 0x246   :  { %v757_v12 = vpop.xlane.xlu0 %756  ;;  %1020 = vadd.xlane.f32.xlu0 %v915_v42  ;;  %vm2735_vm9 = vcmp.ne.s32.totalorder %v422_v40, %v2522_v50  ;;  %v450_v59 = vand.u32 7, %v360_v60  ;;  %v362_v40 = vadd.s32 80, %v2516_v48 }
 0x247   :  { %v2714_v52 = vmax.f32 %v2706_v31, %v757_v12  ;;  %v1106_v12 = vsel %vm1083_vm5, %v2539_v35, 0.0  ;;  %vm1087_vm11 = vmand %vm3180_vm0, %vm2735_vm9  ;;  %vm2747_vm1 = vcmp.ne.s32.totalorder %v436_v33, %v2522_v50  ;;  %vm3186_vm5 = vcmp.eq.s32.totalorder %v2132_v49, %v2070_v32 }
 0x248   :  { %v1110_v22 = vsel %vm1087_vm11, %v2539_v35, 0.0  ;;  %vm1089_vm8 = vmand %vm3183_vm14, %vm2747_vm1  ;;  %vm2759_vm7 = vcmp.ne.s32.totalorder %v450_v59, %v2522_v50  ;;  %v464_v33 = vand.u32 7, %v362_v40  ;;  %v478_v59 = vand.u32 7, %v364_v14 }
 0x249   :  { %3177 = vst [vmem:[#allocation29_spill] sm:$0xff] %v2714_v52  ;;  %1080 = vst.msk [vmem:[#allocation2 + $0x68] sm:$0xff] %vm28_vm15, %v2714_v52  ;;  %845 = vperm.xlu1 %1791, %v2714_v52   ;;  %v2765_v44 = vsel %vm1089_vm8, %v2539_v35, 0.0  ;;  %v366_v40 = vadd.s32 112, %v2516_v48  ;;  %vm3189_vm11 = vcmp.eq.s32.totalorder %v2148_v53, %v2070_v32 }
 0x24a   :  { %vm1091_vm2 = vmand %vm3186_vm5, %vm2759_vm7  ;;  %vm2774_vm0 = vcmp.ne.s32.totalorder %v464_v33, %v2522_v50  ;;  %vm2789_vm8 = vcmp.ne.s32.totalorder %v478_v59, %v2522_v50  ;;  %vm3192_vm5 = vcmp.eq.s32.totalorder %v2164_v57, %v2070_v32  ;;  %v1144_v49 = vmul.f32 %v2765_v44, %v2356_v17 }
 0x24b   :  { %v2780_v52 = vsel %vm1091_vm2, %v2539_v35, 0.0  ;;  %vm1093_vm14 = vmand %vm3189_vm11, %vm2774_vm0  ;;  %v492_v14 = vand.u32 7, %v366_v40 }
 0x24c   :  { %v2795_v33 = vsel %vm1093_vm14, %v2539_v35, 0.0  ;;  %vm1095_vm2 = vmand %vm3192_vm5, %vm2789_vm8  ;;  %vm3195_vm14 = vcmp.eq.s32.totalorder %v2180_v61, %v2070_v32  ;;  %v1140_v32 = vmul.f32 %v1108_v43, %v2336_v3  ;;  %v1221_v3 = vld [vmem:[#allocation5 + $0x18] sm:$0xff] }
 0x24d   :  { %vm2804_vm11 = vcmp.ne.s32.totalorder %v492_v14, %v2522_v50  ;;  %v2810_v47 = vsel %vm1095_vm2, %v2539_v35, 0.0  ;;  %vm623_vm2 = vmand %vm2774_vm0, %vm610_vm13 }
 0x24e   :  { %v831_v42 = vpop.permute.xlu0 %830  ;;  %vm1097_vm5 = vmand %vm3195_vm14, %vm2804_vm11 }
 0x24f   :  { %v868_v48 = vsub.f32 %v2338_v4, %v831_v42  ;;  %v2820_v14 = vsel %vm1097_vm5, %v2539_v35, 0.0  ;;  %v1219_v35 = vld [vmem:[#allocation5 + $0x8] sm:$0xff]  ;;  %vm621_vm14 = vmand %vm2759_vm7, %vm610_vm13 }
 0x250   :  { %vm614_vm0 = vmand %vm2526_vm12, %vm610_vm13 }
 0x251   :  { %v894_v59 = vmul.f32 1.442695, %v868_v48  ;;  %vm619_vm7 = vmand %vm2747_vm1, %vm610_vm13 }
 0x252   :  { %v821_v18 = vpop.permute.xlu0 %820  ;;  %vm627_vm12 = vmand %vm2804_vm11, %vm610_vm13 }
 0x253   :  { %v866_v42 = vsub.f32 %v2344_v9, %v821_v18  ;;  %1818 = vpow2.f32 %v894_v59  ;;  %v1138_v18 = vmul.f32 %v1106_v12, %v2342_v8  ;;  %v1142_v59 = vmul.f32 %v1110_v22, %v2366_v23  ;;  %vm617_vm1 = vmand %vm2735_vm9, %vm610_vm13 }
 0x254   :  { %vm625_vm11 = vmand %vm2789_vm8, %vm610_vm13 }
 0x255   :  { %v890_v57 = vmul.f32 1.442695, %v866_v42  ;;  %vm620_vm9 = vmand %vm2566_vm4, %vm610_vm13 }
 0x256   :  { %v786_v60 = vpop.permute.xlu0 %785  ;;  %vm628_vm8 = vmand %vm2623_vm3, %vm610_vm13 }
 0x257   :  { %v859_v50 = vsub.f32 %v2350_v13, %v786_v60  ;;  %1820 = vpow2.f32 %v890_v57  ;;  %vm618_vm4 = vmand %vm2554_vm6, %vm610_vm13 }
 0x258   :  { %vm626_vm3 = vmand %vm2608_vm10, %vm610_vm13 }
 0x259   :  { %v876_v56 = vmul.f32 1.442695, %v859_v50 }
 0x25a   :  { %v811_v31 = vpop.permute.xlu0 %810 }
 0x25b   :  { %v864_v21 = vsub.f32 %v2356_v17, %v811_v31  ;;  %1822 = vpow2.f32 %v876_v56  ;;  %v1127_v17 = vld [vmem:[#allocation4 + $0x28] sm:$0xff] }
 0x25d   :  { %v886_v61 = vmul.f32 1.442695, %v864_v21 }
 0x25e   :  { %v851_v40 = vpop.permute.xlu0 %850 }
 0x25f   :  { %v872_v13 = vsub.f32 %v2362_v20, %v851_v40  ;;  %1824 = vpow2.f32 %v886_v61  ;;  %v1225_v61 = vld [vmem:[#allocation5 + $0x38] sm:$0xff] }
 0x260   :  { %v1819_v42 = vpop.eup %1818 }
 0x261   :  { %v902_v8 = vmul.f32 1.442695, %v872_v13  ;;  %v916_v56 = vsel %vm623_vm2, %v1819_v42, 0.0 }
 0x262   :  { %v801_v48 = vpop.permute.xlu0 %800 }
 0x263   :  { %1826 = vpow2.f32 %v902_v8 }
 0x264   :  { %v1821_v40 = vpop.eup %1820 }
 0x266   :  { %v841_v62 = vpop.permute.xlu0 %840 }
 0x26d   :  { %1234 = vadd.xlane.f32.xlu1 %v1106_v12  ;;  %v862_v12 = vsub.f32 %v2366_v23, %v801_v48  ;;  %v1223_v23 = vld [vmem:[#allocation5 + $0x28] sm:$0xff] }
 0x26f   :  { %v882_v31 = vmul.f32 1.442695, %v862_v12  ;;  %v1229_v12 = vld [vmem:[#allocation5 + $0x58] sm:$0xff] }
 0x271   :  { %1238 = vadd.xlane.f32.xlu1 %v1108_v43  ;;  %v870_v43 = vsub.f32 %v2369_v29, %v841_v62  ;;  %1828 = vpow2.f32 %v882_v31  ;;  %v3196_v31 = vsub.f32 %v2392_v46, %v2398_v54 }
 0x273   :  { %v898_v50 = vmul.f32 1.442695, %v870_v43  ;;  %v958_v43 = vmul.f32 1.442695, %v3196_v31 }
 0x275   :  { %1242 = vadd.xlane.f32.xlu1 %v1110_v22  ;;  %1830 = vpow2.f32 %v898_v50  ;;  %v954_v50 = vmul.f32 1.442695, %v3197_v10 }
 0x276   :  { %1832 = vpow2.f32 %v958_v43 }
 0x277   :  { %1834 = vpow2.f32 %v954_v50 }
 0x279   :  { %1246 = vadd.xlane.f32.xlu1 %v2765_v44  ;;  %v3200_v44 = vsub.f32 %v2451_v27, %v2463_v38 }
 0x27d   :  { %1250 = vadd.xlane.f32.xlu1 %v2780_v52 }
 0x281   :  { %1254 = vadd.xlane.f32.xlu1 %v2795_v33 }
 0x285   :  { %1258 = vadd.xlane.f32.xlu1 %v2810_v47 }
 0x289   :  { %1262 = vadd.xlane.f32.xlu1 %v2820_v14 }
 0x28d   :  { %1154 = vadd.xlane.f32.xlu1 %v1138_v18  ;;  %v914_v18 = vsel %vm621_vm14, %v1821_v40, 0.0 }
 0x291   :  { %1158 = vadd.xlane.f32.xlu1 %v1140_v32  ;;  %v1823_v32 = vpop.eup %1822 }
 0x292   :  { %v907_v13 = vsel %vm614_vm0, %v1823_v32, 0.0  ;;  %v3198_v32 = vsub.f32 %v2417_v2, %v2429_v11  ;;  %v1146_v2 = vmul.f32 %v2780_v52, %v2344_v9  ;;  %v924_v52 = vld [vmem:[#allocation3 + $0x10] sm:$0xff] }
 0x293   :  { %v1237_v60 = vpop.xlane.xlu0 %1236 }
 0x294   :  { %v1267_v57 = vadd.f32 %v1237_v60, %v1219_v35  ;;  %v1825_v35 = vpop.eup %1824  ;;  %v1227_v60 = vld [vmem:[#allocation5 + $0x48] sm:$0xff] }
 0x295   :  { %1162 = vadd.xlane.f32.xlu1 %v1142_v59  ;;  %v912_v63 = vsel %vm619_vm7, %v1825_v35, 0.0  ;;  %v1827_v8 = vpop.eup %1826 }
 0x296   :  { %1283 = vst.msk [vmem:[#allocation5 + $0x8] sm:$0xff] %vm28_vm15, %v1267_v57  ;;  %v1829_v34 = vpop.eup %1828 }
 0x297   :  { %v1241_v21 = vpop.xlane.xlu0 %1240  ;;  %v910_v40 = vsel %vm617_vm1, %v1829_v34, 0.0 }
 0x298   :  { %v1269_v22 = vadd.f32 %v1241_v21, %v1221_v3  ;;  %v920_v21 = vsel %vm627_vm12, %v1827_v8, 0.0 }
 0x299   :  { %1022 = vadd.xlane.f32.xlu1 %v916_v56  ;;  %v1231_v56 = vld [vmem:[#allocation5 + $0x68] sm:$0xff] }
 0x29a   :  { %1285 = vst.msk [vmem:[#allocation5 + $0x18] sm:$0xff] %vm28_vm15, %v1269_v22 }
 0x29b   :  { %v1245_v45 = vpop.xlane.xlu0 %1244 }
 0x29c   :  { %v1271_v48 = vadd.f32 %v1245_v45, %v1223_v23  ;;  %v1831_v23 = vpop.eup %1830  ;;  %v1233_v45 = vld [vmem:[#allocation5 + $0x78] sm:$0xff] }
 0x29d   :  { %1018 = vadd.xlane.f32.xlu1 %v914_v18  ;;  %v1123_v18 = vld [vmem:[#allocation4 + $0x8] sm:$0xff] }
 0x29e   :  { %1287 = vst.msk [vmem:[#allocation5 + $0x28] sm:$0xff] %vm28_vm15, %v1271_v48  ;;  %v918_v48 = vsel %vm625_vm11, %v1831_v23, 0.0 }
 0x29f   :  { %v1249_v62 = vpop.xlane.xlu0 %1248 }
 0x2a0   :  { %v1273_v41 = vadd.f32 %v1249_v62, %v1225_v61  ;;  %v960_v61 = vmul.f32 1.442695, %v3198_v32 }
 0x2a1   :  { %1004 = vadd.xlane.f32.xlu1 %v907_v13 }
 0x2a2   :  { %1289 = vst.msk [vmem:[#allocation5 + $0x38] sm:$0xff] %vm28_vm15, %v1273_v41  ;;  %1836 = vpow2.f32 %v960_v61  ;;  %v3199_v41 = vsub.f32 %v2434_v15, %v2446_v25  ;;  %v1833_v15 = vpop.eup %1832  ;;  %v1148_v25 = vmul.f32 %v2795_v33, %v2338_v4  ;;  %v922_v4 = vld [vmem:[#allocation3] sm:$0xff] }
 0x2a3   :  { %v1253_v59 = vpop.xlane.xlu0 %1252  ;;  %v988_v27 = vmul.f32 %v1833_v15, %v924_v52  ;;  %v1835_v38 = vpop.eup %1834 }
 0x2a4   :  { %v1275_v42 = vadd.f32 %v1253_v59, %v1227_v60  ;;  %v976_v13 = vmul.f32 1.442695, %v3199_v41  ;;  %v986_v43 = vmul.f32 %v1835_v38, %v922_v4 }
 0x2a5   :  { %1014 = vadd.xlane.f32.xlu1 %v912_v63 }
 0x2a6   :  { %1291 = vst.msk [vmem:[#allocation5 + $0x48] sm:$0xff] %vm28_vm15, %v1275_v42  ;;  %1838 = vpow2.f32 %v976_v13  ;;  %v972_v42 = vmul.f32 1.442695, %v3200_v44 }
 0x2a7   :  { %v1257_v57 = vpop.xlane.xlu0 %1256 }
 0x2a8   :  { %v1277_v3 = vadd.f32 %v1257_v57, %v1229_v12 }
 0x2a9   :  { %1030 = vadd.xlane.f32.xlu1 %v920_v21 }
 0x2aa   :  { %1293 = vst.msk [vmem:[#allocation5 + $0x58] sm:$0xff] %vm28_vm15, %v1277_v3  ;;  %v1150_v3 = vmul.f32 %v2810_v47, %v2369_v29 }
 0x2ab   :  { %v1261_v53 = vpop.xlane.xlu0 %1260 }
 0x2ac   :  { %v1279_v22 = vadd.f32 %v1261_v53, %v1231_v56 }
 0x2ad   :  { %1010 = vadd.xlane.f32.xlu1 %v910_v40 }
 0x2ae   :  { %1295 = vst.msk [vmem:[#allocation5 + $0x68] sm:$0xff] %vm28_vm15, %v1279_v22  ;;  %v1152_v22 = vmul.f32 %v2820_v14, %v2362_v20 }
 0x2af   :  { %v1265_v46 = vpop.xlane.xlu0 %1264  ;;  %v1837_v53 = vpop.eup %1836 }
 0x2b0   :  { %v1281_v54 = vadd.f32 %v1265_v46, %v1233_v45  ;;  %v925_v45 = vld [vmem:[#allocation3 + $0x18] sm:$0xff] }
 0x2b1   :  { %1026 = vadd.xlane.f32.xlu1 %v918_v48  ;;  %v933_v48 = vld [vmem:[#allocation3 + $0x58] sm:$0xff] }
 0x2b2   :  { %1297 = vst.msk [vmem:[#allocation5 + $0x78] sm:$0xff] %vm28_vm15, %v1281_v54 }
 0x2b3   :  { %v1157_v62 = vpop.xlane.xlu0 %1156  ;;  %v1839_v50 = vpop.eup %1838 }
 0x2b4   :  { %v1187_v58 = vadd.f32 %v1157_v62, %v1123_v18  ;;  %v997_v14 = vmul.f32 %v1839_v50, %v933_v48  ;;  %v931_v62 = vld [vmem:[#allocation3 + $0x48] sm:$0xff]  ;;  %v3205_v50 = vld [vmem:[#allocation7_spill] sm:$0xff] }
 0x2b5   :  { %1166 = vadd.xlane.f32.xlu1 %v1144_v49 }
 0x2b6   :  { %1203 = vst.msk [vmem:[#allocation4 + $0x8] sm:$0xff] %vm28_vm15, %v1187_v58 }
 0x2b7   :  { %v1161_v11 = vpop.xlane.xlu0 %1160 }
 0x2b8   :  { %v1189_v35 = vadd.f32 %v1161_v11, %v1125_v1  ;;  %v816_v60 = vpop.permute.xlu1 %815 }
 0x2b9   :  { %v865_v59 = vsub.f32 %v2497_v36, %v816_v60  ;;  %1170 = vadd.xlane.f32.xlu1 %v1146_v2 }
 0x2ba   :  { %1205 = vst.msk [vmem:[#allocation4 + $0x18] sm:$0xff] %vm28_vm15, %v1189_v35 }
 0x2bb   :  { %v888_v63 = vmul.f32 1.442695, %v865_v59  ;;  %v1165_v9 = vpop.xlane.xlu0 %1164  ;;  %v1608_v59 = vld [vmem:[#allocation6 + $0x18] sm:$0xff] }
 0x2bc   :  { %v1191_v8 = vadd.f32 %v1165_v9, %v1127_v17  ;;  %v856_v12 = vpop.permute.xlu1 %855  ;;  %v1624_v44 = vmax.f32 %v1608_v59, 1.0  ;;  %v1149_v9 = vmul.f32 %v3202_v51, %v2354_v16 }
 0x2bd   :  { %1840 = vpow2.f32 %v888_v63  ;;  %v873_v57 = vsub.f32 %v2500_v7, %v856_v12  ;;  %1174 = vadd.xlane.f32.xlu1 %v1148_v25 }
 0x2be   :  { %1842 = vpow2.f32 %v972_v42  ;;  %1207 = vst.msk [vmem:[#allocation4 + $0x28] sm:$0xff] %vm28_vm15, %v1191_v8  ;;  %v3201_v42 = vld [vmem:[#allocation21_spill] sm:$0xff]  ;;  %v1512_v8 = vld [vmem:[#allocation5 + $0x18] sm:$0xff] }
 0x2bf   :  { %v904_v21 = vmul.f32 1.442695, %v873_v57  ;;  %v1007_v34 = vpop.xlane.xlu0 %1006  ;;  %v1147_v15 = vmul.f32 %v3201_v42, %v2360_v19  ;;  %v1576_v19 = vld [vmem:[%s3104_s4 + $0x18] sm:$0xff] }
 0x2c0   :  { %v1036_v33 = vadd.f32 %v1007_v34, %v988_v27  ;;  %v806_v56 = vpop.permute.xlu1 %805  ;;  %v3203_v27 = vld [vmem:[#allocation23_spill] sm:$0xff]  ;;  %v3210_v42 = vld [vmem:[#allocation14_spill] sm:$0xff] }
 0x2c1   :  { %1844 = vpow2.f32 %v904_v21  ;;  %v863_v31 = vsub.f32 %v2503_v30, %v806_v56  ;;  %1178 = vadd.xlane.f32.xlu1 %v1150_v3  ;;  %v989_v30 = vmul.f32 %v1837_v53, %v925_v45  ;;  %v1496_v57 = vld [vmem:[#allocation4 + $0x18] sm:$0xff]  ;;  %v1151_v26 = vmul.f32 %v3203_v27, %v2506_v6  ;;  %v1220_v56 = vld [vmem:[#allocation5 + $0x10] sm:$0xff]  ;;  %v1222_v53 = vld [vmem:[#allocation5 + $0x20] sm:$0xff] }
 0x2c2   :  { %1053 = vst.msk [vmem:[#allocation3 + $0x10] sm:$0xff] %vm28_vm15, %v1036_v33  ;;  %v1153_v3 = vmul.f32 %v2639_v28, %v2500_v7  ;;  %v1226_v45 = vld [vmem:[#allocation5 + $0x40] sm:$0xff] }
 0x2c3   :  { %v884_v40 = vmul.f32 1.442695, %v863_v31  ;;  %v1003_v23 = vpop.xlane.xlu0 %1002 }
 0x2c4   :  { %v1034_v29 = vadd.f32 %v1003_v23, %v986_v43  ;;  %v846_v47 = vpop.permute.xlu1 %845 }
 0x2c5   :  { %1846 = vpow2.f32 %v884_v40  ;;  %v871_v10 = vsub.f32 %v2506_v6, %v846_v47  ;;  %1182 = vadd.xlane.f32.xlu1 %v1152_v22  ;;  %v1218_v6 = vld [vmem:[#allocation5] sm:$0xff]  ;;  %v1224_v22 = vld [vmem:[#allocation5 + $0x30] sm:$0xff] }
 0x2c6   :  { %1051 = vst.msk [vmem:[#allocation3] sm:$0xff] %vm28_vm15, %v1034_v29 }
 0x2c7   :  { %v900_v46 = vmul.f32 1.442695, %v871_v10  ;;  %v1009_v54 = vpop.xlane.xlu0 %1008 }
 0x2c8   :  { %v1037_v18 = vadd.f32 %v1009_v54, %v989_v30  ;;  %v3204_v30 = vld [vmem:[#allocation8_spill] sm:$0xff]  ;;  %v1228_v54 = vld [vmem:[#allocation5 + $0x50] sm:$0xff] }
 0x2c9   :  { %1848 = vpow2.f32 %v900_v46  ;;  %v948_v46 = vsub.f32 %v3205_v50, %v3204_v30  ;;  %v1431_v48 = vld [vmem:[#allocation3 + $0x10] sm:$0xff]  ;;  %v3216_v30 = vld [vmem:[#allocation20_spill] sm:$0xff]  ;;  %v3217_v50 = vld [vmem:[#allocation19_spill] sm:$0xff] }
 0x2ca   :  { %v1841_v20 = vpop.eup %1840  ;;  %1054 = vst.msk [vmem:[#allocation3 + $0x18] sm:$0xff] %vm28_vm15, %v1037_v18 }
 0x2cb   :  { %v1843_v32 = vpop.eup %1842  ;;  %v1025_v61 = vpop.xlane.xlu0 %1024  ;;  %v913_v49 = vsel %vm620_vm9, %v1841_v20, 0.0 }
 0x2cc   :  { %v1045_v58 = vadd.f32 %v1025_v61, %v997_v14  ;;  %1016 = vadd.xlane.f32.xlu0 %v913_v49  ;;  %v995_v39 = vmul.f32 %v1843_v32, %v931_v62  ;;  %v974_v14 = vmul.f32 1.442695, %v948_v46  ;;  %v3206_v32 = vld [vmem:[#allocation10_spill] sm:$0xff]  ;;  %v3207_v61 = vld [vmem:[#allocation9_spill] sm:$0xff]  ;;  %v1230_v62 = vld [vmem:[#allocation5 + $0x60] sm:$0xff]  ;;  %v950_v46 = vsub.f32 %v3217_v50, %v3216_v30 }
 0x2cd   :  { %v1429_v29 = vld [vmem:[#allocation3] sm:$0xff]  ;;  %v946_v49 = vsub.f32 %v3207_v61, %v3206_v32 }
 0x2ce   :  { %v1845_v1 = vpop.eup %1844  ;;  %1062 = vst.msk [vmem:[#allocation3 + $0x58] sm:$0xff] %vm28_vm15, %v1045_v58 }
 0x2cf   :  { %v1021_v41 = vpop.xlane.xlu0 %1020  ;;  %v921_v13 = vsel %vm628_vm8, %v1845_v1, 0.0 }
 0x2d0   :  { %v1043_v2 = vadd.f32 %v1021_v41, %v995_v39  ;;  %1032 = vadd.xlane.f32.xlu0 %v921_v13  ;;  %v970_v39 = vmul.f32 1.442695, %v946_v49  ;;  %v1232_v41 = vld [vmem:[#allocation5 + $0x70] sm:$0xff]  ;;  %v1605_v13 = vld [vmem:[#allocation6] sm:$0xff] }
 0x2d1   :  { %v1432_v11 = vld [vmem:[#allocation3 + $0x18] sm:$0xff]  ;;  %v1621_v59 = vmax.f32 %v1605_v13, 1.0 }
 0x2d2   :  { %v1847_v35 = vpop.eup %1846  ;;  %1850 = vlog2.f32 %v1432_v11  ;;  %1060 = vst.msk [vmem:[#allocation3 + $0x48] sm:$0xff] %vm28_vm15, %v1043_v2  ;;  %v3208_v2 = vld [vmem:[#allocation12_spill] sm:$0xff]  ;;  %v3209_v11 = vld [vmem:[#allocation11_spill] sm:$0xff] }
 0x2d3   :  { %v911_v55 = vsel %vm618_vm4, %v1847_v35, 0.0  ;;  %1852 = vrcp.f32 %v1624_v44  ;;  %v939_v35 = vsub.f32 %v3209_v11, %v3208_v2  ;;  %v1607_v44 = vld [vmem:[#allocation6 + $0x10] sm:$0xff] }
 0x2d4   :  { %1012 = vadd.xlane.f32.xlu0 %v911_v55  ;;  %1854 = vlog2.f32 %v1429_v29  ;;  %v1575_v11 = vld [vmem:[%s3104_s4 + $0x10] sm:$0xff] }
 0x2d5   :  { %1856 = vlog2.f32 %v1431_v48 }
 0x2d6   :  { %v1849_v60 = vpop.eup %1848  ;;  %1858 = vpow2.f32 %v974_v14 }
 0x2d7   :  { %v919_v17 = vsel %vm626_vm3, %v1849_v60, 0.0  ;;  %1860 = vpow2.f32 %v970_v39  ;;  %v978_v39 = vmul.f32 1.442695, %v950_v46 }
 0x2d8   :  { %1028 = vadd.xlane.f32.xlu0 %v919_v17  ;;  %v1122_v17 = vld [vmem:[#allocation4] sm:$0xff]  ;;  %1862 = vrcp.f32 %v1621_v59 }
 0x2dc   :  { %1168 = vadd.xlane.f32.xlu0 %v1145_v37  ;;  %v956_v37 = vmul.f32 1.442695, %v939_v35 }
 0x2de   :  { %1864 = vpow2.f32 %v956_v37 }
 0x2df   :  { %v1851_v25 = vpop.eup %1850 }
 0x2e0   :  { %v1452_v63 = vmul.f32 0.6931472, %v1851_v25  ;;  %1172 = vadd.xlane.f32.xlu0 %v1147_v15  ;;  %v1853_v16 = vpop.eup %1852  ;;  %v3211_v15 = vld [vmem:[#allocation13_spill] sm:$0xff] }
 0x2e1   :  { %v944_v25 = vsub.f32 %v3211_v15, %v3210_v42 }
 0x2e2   :  { %v1480_v52 = vadd.f32 %v1452_v63, %v1416_v24  ;;  %v1855_v63 = vpop.eup %1854 }
 0x2e3   :  { %v966_v27 = vmul.f32 1.442695, %v944_v25 }
 0x2e4   :  { %v1528_v12 = vmul.f32 %v1512_v8, %v1480_v52  ;;  %1176 = vadd.xlane.f32.xlu0 %v1149_v9  ;;  %v1623_v9 = vmax.f32 %v1607_v44, 1.0  ;;  %v3212_v52 = vld [vmem:[#allocation16_spill] sm:$0xff]  ;;  %v3213_v8 = vld [vmem:[#allocation15_spill] sm:$0xff] }
 0x2e6   :  { %v1544_v36 = vsub.f32 %v1496_v57, %v1528_v12  ;;  %v952_v12 = vsub.f32 %v3213_v8, %v3212_v52  ;;  %v1124_v57 = vld [vmem:[#allocation4 + $0x10] sm:$0xff]  ;;  %1866 = vrcp.f32 %v1623_v9 }
 0x2e7   :  { %1868 = vpow2.f32 %v966_v27 }
 0x2e8   :  { %v1560_v38 = vsub.f32 0.0, %v1544_v36  ;;  %1180 = vadd.xlane.f32.xlu0 %v1151_v26  ;;  %v1446_v26 = vmul.f32 0.6931472, %v1855_v63  ;;  %v1857_v36 = vpop.eup %1856  ;;  %v928_v63 = vld [vmem:[#allocation3 + $0x30] sm:$0xff] }
 0x2ea   :  { %v1592_v21 = vmul.f32 %v1576_v19, %v1560_v38 }
 0x2ec   :  { %v1644_v34 = vmul.f32 %v1853_v16, %v1592_v21  ;;  %1184 = vadd.xlane.f32.xlu0 %v1153_v3  ;;  %v1413_v3 = vld [vmem:[#allocation2] sm:$0xff]  ;;  %v982_v21 = vmul.f32 1.442695, %v952_v12  ;;  %v936_v12 = vld [vmem:[#allocation3 + $0x70] sm:$0xff] }
 0x2ee   :  { %1672 = vst.msk [vmem:[%s3105_s6 + $0x18] sm:$0xff] %vm28_vm15, %v1644_v34  ;;  %v1126_v34 = vld [vmem:[#allocation4 + $0x20] sm:$0xff]  ;;  %1870 = vpow2.f32 %v982_v21 }
 0x2f6   :  { %v1235_v4 = vpop.xlane.xlu1 %1234 }
 0x2f7   :  { %v1266_v33 = vadd.f32 %v1235_v4, %v1218_v6  ;;  %v1859_v6 = vpop.eup %1858  ;;  %v3214_v4 = vld [vmem:[#allocation18_spill] sm:$0xff] }
 0x2f9   :  { %1282 = vst.msk [vmem:[#allocation5] sm:$0xff] %vm28_vm15, %v1266_v33  ;;  %v3215_v33 = vld [vmem:[#allocation17_spill] sm:$0xff] }
 0x2fa   :  { %v1239_v31 = vpop.xlane.xlu1 %1238 }
 0x2fb   :  { %v1268_v43 = vadd.f32 %v1239_v31, %v1220_v56  ;;  %v942_v56 = vsub.f32 %v3215_v33, %v3214_v4  ;;  %v1477_v31 = vadd.f32 %v1446_v26, %v1413_v3  ;;  %v934_v33 = vld [vmem:[#allocation3 + $0x60] sm:$0xff] }
 0x2fd   :  { %1284 = vst.msk [vmem:[#allocation5 + $0x10] sm:$0xff] %vm28_vm15, %v1268_v43  ;;  %v1450_v43 = vmul.f32 0.6931472, %v1857_v36 }
 0x2fe   :  { %v1243_v7 = vpop.xlane.xlu1 %1242 }
 0x2ff   :  { %v1270_v28 = vadd.f32 %v1243_v7, %v1222_v53  ;;  %v932_v53 = vld [vmem:[#allocation3 + $0x50] sm:$0xff] }
 0x300   :  { %v1509_v16 = vld [vmem:[#allocation5] sm:$0xff]  ;;  %v996_v29 = vmul.f32 %v1859_v6, %v932_v53 }
 0x301   :  { %1286 = vst.msk [vmem:[#allocation5 + $0x20] sm:$0xff] %vm28_vm15, %v1270_v28  ;;  %v1525_v28 = vmul.f32 %v1509_v16, %v1477_v31  ;;  %v1606_v31 = vld [vmem:[#allocation6 + $0x8] sm:$0xff] }
 0x302   :  { %v1247_v40 = vpop.xlane.xlu1 %1246 }
 0x303   :  { %v1272_v23 = vadd.f32 %v1247_v40, %v1224_v22  ;;  %v1415_v40 = vld [vmem:[#allocation2 + $0x10] sm:$0xff] }
 0x305   :  { %1288 = vst.msk [vmem:[#allocation5 + $0x30] sm:$0xff] %vm28_vm15, %v1272_v23  ;;  %v1511_v23 = vld [vmem:[#allocation5 + $0x10] sm:$0xff] }
 0x306   :  { %v1251_v47 = vpop.xlane.xlu1 %1250 }
 0x307   :  { %v1274_v10 = vadd.f32 %v1251_v47, %v1226_v45  ;;  %v1861_v47 = vpop.eup %1860 }
 0x309   :  { %1290 = vst.msk [vmem:[#allocation5 + $0x40] sm:$0xff] %vm28_vm15, %v1274_v10  ;;  %v962_v10 = vmul.f32 1.442695, %v942_v56 }
 0x30a   :  { %v1255_v18 = vpop.xlane.xlu1 %1254 }
 0x30b   :  { %v1276_v20 = vadd.f32 %v1255_v18, %v1228_v54  ;;  %v1479_v54 = vadd.f32 %v1450_v43, %v1415_v40  ;;  %v930_v18 = vld [vmem:[#allocation3 + $0x40] sm:$0xff]  ;;  %1872 = vpow2.f32 %v962_v10 }
 0x30c   :  { %1874 = vpow2.f32 %v978_v39  ;;  %v1414_v39 = vld [vmem:[#allocation2 + $0x8] sm:$0xff] }
 0x30d   :  { %1292 = vst.msk [vmem:[#allocation5 + $0x50] sm:$0xff] %vm28_vm15, %v1276_v20  ;;  %v1573_v20 = vld [vmem:[%s3104_s4] sm:$0xff]  ;;  %v1527_v32 = vmul.f32 %v1511_v23, %v1479_v54  ;;  %v3218_v54 = vsub.f32 %v2668_v5, %v2676_v0  ;;  %v3220_v5 = vld [vmem:[#allocation25_spill] sm:$0xff] }
 0x30e   :  { %v1259_v58 = vpop.xlane.xlu1 %1258  ;;  %v1613_v23 = vld [vmem:[#allocation6 + $0x40] sm:$0xff] }
 0x30f   :  { %v1278_v1 = vadd.f32 %v1259_v58, %v1230_v62  ;;  %v994_v58 = vmul.f32 %v1861_v47, %v930_v18  ;;  %v1629_v30 = vmax.f32 %v1613_v23, 1.0 }
 0x311   :  { %1294 = vst.msk [vmem:[#allocation5 + $0x60] sm:$0xff] %vm28_vm15, %v1278_v1  ;;  %v1863_v1 = vpop.eup %1862 }
 0x312   :  { %v1263_v55 = vpop.xlane.xlu1 %1262  ;;  %v1865_v2 = vpop.eup %1864 }
 0x313   :  { %v1280_v60 = vadd.f32 %v1263_v55, %v1232_v41  ;;  %v923_v55 = vld [vmem:[#allocation3 + $0x8] sm:$0xff]  ;;  %v1867_v44 = vpop.eup %1866 }
 0x314   :  { %v987_v42 = vmul.f32 %v1865_v2, %v923_v55  ;;  %v1869_v15 = vpop.eup %1868 }
 0x315   :  { %1296 = vst.msk [vmem:[#allocation5 + $0x70] sm:$0xff] %vm28_vm15, %v1280_v60  ;;  %v1871_v9 = vpop.eup %1870  ;;  %v992_v52 = vmul.f32 %v1869_v15, %v928_v63  ;;  %v1617_v15 = vld [vmem:[#allocation6 + $0x60] sm:$0xff] }
 0x316   :  { %v1155_v24 = vpop.xlane.xlu1 %1154  ;;  %v1000_v26 = vmul.f32 %v1871_v9, %v936_v12  ;;  %v1419_v9 = vld [vmem:[#allocation2 + $0x30] sm:$0xff] }
 0x317   :  { %v1186_v51 = vadd.f32 %v1155_v24, %v1122_v17 }
 0x318   :  { %v1873_v36 = vpop.eup %1872 }
 0x319   :  { %1202 = vst.msk [vmem:[#allocation4] sm:$0xff] %vm28_vm15, %v1186_v51  ;;  %v1875_v6 = vpop.eup %1874 }
 0x31a   :  { %v1159_v19 = vpop.xlane.xlu1 %1158  ;;  %v998_v53 = vmul.f32 %v1875_v6, %v934_v33  ;;  %v1574_v6 = vld [vmem:[%s3104_s4 + $0x8] sm:$0xff] }
 0x31b   :  { %v1188_v38 = vadd.f32 %v1159_v19, %v1124_v57 }
 0x31d   :  { %1204 = vst.msk [vmem:[#allocation4 + $0x10] sm:$0xff] %vm28_vm15, %v1188_v38  ;;  %v926_v38 = vld [vmem:[#allocation3 + $0x20] sm:$0xff] }
 0x31e   :  { %v1163_v7 = vpop.xlane.xlu1 %1162 }
 0x31f   :  { %v1190_v22 = vadd.f32 %v1163_v7, %v1126_v34  ;;  %v990_v34 = vmul.f32 %v1873_v36, %v926_v38 }
 0x320   :  { %v1493_v45 = vld [vmem:[#allocation4] sm:$0xff] }
 0x321   :  { %v1541_v48 = vsub.f32 %v1493_v45, %v1525_v28  ;;  %1206 = vst.msk [vmem:[#allocation4 + $0x20] sm:$0xff] %vm28_vm15, %v1190_v22  ;;  %v1622_v28 = vmax.f32 %v1606_v31, 1.0  ;;  %v1611_v22 = vld [vmem:[#allocation6 + $0x30] sm:$0xff] }
 0x322   :  { %v1023_v14 = vpop.xlane.xlu1 %1022  ;;  %v1128_v45 = vld [vmem:[#allocation4 + $0x30] sm:$0xff]  ;;  %v1627_v47 = vmax.f32 %v1611_v22, 1.0  ;;  %v3225_v22 = vld [vmem:[#allocation28_spill] sm:$0xff] }
 0x323   :  { %v1557_v61 = vsub.f32 0.0, %v1541_v48  ;;  %v1044_v49 = vadd.f32 %v1023_v14, %v996_v29  ;;  %v968_v48 = vmul.f32 1.442695, %v3218_v54 }
 0x324   :  { %v1495_v62 = vld [vmem:[#allocation4 + $0x10] sm:$0xff] }
 0x325   :  { %v1589_v41 = vmul.f32 %v1573_v20, %v1557_v61  ;;  %v1543_v13 = vsub.f32 %v1495_v62, %v1527_v32  ;;  %1061 = vst.msk [vmem:[#allocation3 + $0x50] sm:$0xff] %vm28_vm15, %v1044_v49  ;;  %v1130_v20 = vld [vmem:[#allocation4 + $0x40] sm:$0xff]  ;;  %v1615_v49 = vld [vmem:[#allocation6 + $0x50] sm:$0xff] }
 0x326   :  { %v1019_v35 = vpop.xlane.xlu1 %1018 }
 0x327   :  { %v1638_v60 = vmul.f32 %v1863_v1, %v1589_v41  ;;  %v1559_v59 = vsub.f32 0.0, %v1543_v13  ;;  %v1042_v17 = vadd.f32 %v1019_v35, %v994_v58  ;;  %v3219_v41 = vld [vmem:[#allocation24_spill] sm:$0xff] }
 0x328   :  { %v3221_v0 = vsub.f32 %v3219_v41, %v3220_v5 }
 0x329   :  { %1669 = vst.msk [vmem:[%s3105_s6] sm:$0xff] %vm28_vm15, %v1638_v60  ;;  %v1591_v37 = vmul.f32 %v1575_v11, %v1559_v59  ;;  %1059 = vst.msk [vmem:[#allocation3 + $0x40] sm:$0xff] %vm28_vm15, %v1042_v17  ;;  %v1132_v11 = vld [vmem:[#allocation4 + $0x50] sm:$0xff]  ;;  %v1609_v60 = vld [vmem:[#allocation6 + $0x20] sm:$0xff]  ;;  %v1631_v59 = vmax.f32 %v1615_v49, 1.0 }
 0x32a   :  { %v1005_v25 = vpop.xlane.xlu1 %1004  ;;  %v984_v13 = vmul.f32 1.442695, %v3221_v0  ;;  %v1421_v17 = vld [vmem:[#allocation2 + $0x40] sm:$0xff]  ;;  %v1625_v36 = vmax.f32 %v1609_v60, 1.0 }
 0x32b   :  { %v1642_v24 = vmul.f32 %v1867_v44, %v1591_v37  ;;  %v1035_v51 = vadd.f32 %v1005_v25, %v987_v42  ;;  %v1510_v44 = vld [vmem:[#allocation5 + $0x8] sm:$0xff]  ;;  %v1417_v0 = vld [vmem:[#allocation2 + $0x20] sm:$0xff] }
 0x32c   :  { %v1439_v3 = vld [vmem:[#allocation3 + $0x50] sm:$0xff] }
 0x32d   :  { %1671 = vst.msk [vmem:[%s3105_s6 + $0x10] sm:$0xff] %vm28_vm15, %v1642_v24  ;;  %1052 = vst.msk [vmem:[#allocation3 + $0x8] sm:$0xff] %vm28_vm15, %v1035_v51 }
 0x32e   :  { %v1015_v8 = vpop.xlane.xlu1 %1014 }
 0x32f   :  { %v1040_v57 = vadd.f32 %v1015_v8, %v992_v52  ;;  %v3222_v52 = vld [vmem:[#allocation26_spill] sm:$0xff]  ;;  %v3223_v8 = vld [vmem:[#allocation27_spill] sm:$0xff] }
 0x330   :  { %v1437_v27 = vld [vmem:[#allocation3 + $0x40] sm:$0xff]  ;;  %v3224_v12 = vsub.f32 %v3222_v52, %v3223_v8 }
 0x331   :  { %1057 = vst.msk [vmem:[#allocation3 + $0x30] sm:$0xff] %vm28_vm15, %v1040_v57  ;;  %1876 = vlog2.f32 %v1437_v27  ;;  %v1494_v27 = vld [vmem:[#allocation4 + $0x8] sm:$0xff]  ;;  %v1425_v52 = vld [vmem:[#allocation2 + $0x60] sm:$0xff] }
 0x332   :  { %v1031_v19 = vpop.xlane.xlu1 %1030  ;;  %v964_v57 = vmul.f32 1.442695, %v3224_v12  ;;  %v1497_v8 = vld [vmem:[#allocation4 + $0x20] sm:$0xff] }
 0x333   :  { %v1048_v21 = vadd.f32 %v1031_v19, %v1000_v26  ;;  %v1134_v26 = vld [vmem:[#allocation4 + $0x60] sm:$0xff]  ;;  %v1423_v19 = vld [vmem:[#allocation2 + $0x50] sm:$0xff] }
 0x334   :  { %v1430_v16 = vld [vmem:[#allocation3 + $0x8] sm:$0xff] }
 0x335   :  { %1878 = vlog2.f32 %v1430_v16  ;;  %1065 = vst.msk [vmem:[#allocation3 + $0x70] sm:$0xff] %vm28_vm15, %v1048_v21  ;;  %v1633_v21 = vmax.f32 %v1617_v15, 1.0  ;;  %v1515_v16 = vld [vmem:[#allocation5 + $0x30] sm:$0xff] }
 0x336   :  { %1880 = vlog2.f32 %v1439_v3  ;;  %v1011_v4 = vpop.xlane.xlu1 %1010  ;;  %v1427_v15 = vld [vmem:[#allocation2 + $0x70] sm:$0xff] }
 0x337   :  { %v1038_v56 = vadd.f32 %v1011_v4, %v990_v34  ;;  %v1517_v34 = vld [vmem:[#allocation5 + $0x40] sm:$0xff] }
 0x338   :  { %v1435_v43 = vld [vmem:[#allocation3 + $0x30] sm:$0xff] }
 0x339   :  { %1882 = vlog2.f32 %v1435_v43  ;;  %1055 = vst.msk [vmem:[#allocation3 + $0x20] sm:$0xff] %vm28_vm15, %v1038_v56  ;;  %v1619_v56 = vld [vmem:[#allocation6 + $0x70] sm:$0xff] }
 0x33a   :  { %v1027_v7 = vpop.xlane.xlu1 %1026  ;;  %1884 = vrcp.f32 %v1622_v28 }
 0x33b   :  { %v1046_v40 = vadd.f32 %v1027_v7, %v998_v53 }
 0x33c   :  { %v1443_v29 = vld [vmem:[#allocation3 + $0x70] sm:$0xff] }
 0x33d   :  { %1063 = vst.msk [vmem:[#allocation3 + $0x60] sm:$0xff] %vm28_vm15, %v1046_v40  ;;  %1886 = vlog2.f32 %v1443_v29  ;;  %v3226_v40 = vld [vmem:[#allocation29_spill] sm:$0xff] }
 0x33e   :  { %v1167_v10 = vpop.xlane.xlu1 %1166  ;;  %v1877_v46 = vpop.eup %1876  ;;  %v3227_v23 = vsub.f32 %v3225_v22, %v3226_v40 }
 0x33f   :  { %v1192_v50 = vadd.f32 %v1167_v10, %v1128_v45  ;;  %v1462_v62 = vmul.f32 0.6931472, %v1877_v46 }
 0x340   :  { %v1433_v18 = vld [vmem:[#allocation3 + $0x20] sm:$0xff]  ;;  %v980_v45 = vmul.f32 1.442695, %v3227_v23 }
 0x341   :  { %1888 = vlog2.f32 %v1433_v18  ;;  %1208 = vst.msk [vmem:[#allocation4 + $0x30] sm:$0xff] %vm28_vm15, %v1192_v50  ;;  %v1485_v24 = vadd.f32 %v1462_v62, %v1421_v17 }
 0x342   :  { %v1879_v14 = vpop.eup %1878  ;;  %1890 = vrcp.f32 %v1627_v47  ;;  %v1171_v32 = vpop.xlane.xlu1 %1170 }
 0x343   :  { %v1881_v61 = vpop.eup %1880  ;;  %1892 = vrcp.f32 %v1629_v30  ;;  %v1448_v58 = vmul.f32 0.6931472, %v1879_v14  ;;  %v1194_v1 = vadd.f32 %v1171_v32, %v1130_v20  ;;  %v1533_v53 = vmul.f32 %v1517_v34, %v1485_v24  ;;  %v1519_v30 = vld [vmem:[#allocation5 + $0x50] sm:$0xff]  ;;  %v1581_v32 = vld [vmem:[%s3104_s4 + $0x40] sm:$0xff] }
 0x344   :  { %1894 = vpow2.f32 %v968_v48  ;;  %v1441_v2 = vld [vmem:[#allocation3 + $0x60] sm:$0xff]  ;;  %v1466_v37 = vmul.f32 0.6931472, %v1881_v61  ;;  %v1136_v48 = vld [vmem:[#allocation4 + $0x70] sm:$0xff]  ;;  %v1635_v20 = vmax.f32 %v1619_v56, 1.0 }
 0x345   :  { %v1478_v35 = vadd.f32 %v1448_v58, %v1414_v39  ;;  %1896 = vlog2.f32 %v1441_v2  ;;  %1210 = vst.msk [vmem:[#allocation4 + $0x40] sm:$0xff] %vm28_vm15, %v1194_v1  ;;  %v1579_v14 = vld [vmem:[%s3104_s4 + $0x30] sm:$0xff] }
 0x346   :  { %v1883_v55 = vpop.eup %1882  ;;  %v1175_v42 = vpop.xlane.xlu1 %1174  ;;  %1898 = vpow2.f32 %v984_v13  ;;  %v1487_v4 = vadd.f32 %v1466_v37, %v1423_v19  ;;  %v1523_v56 = vld [vmem:[#allocation5 + $0x70] sm:$0xff] }
 0x347   :  { %v1526_v25 = vmul.f32 %v1510_v44, %v1478_v35  ;;  %v1458_v63 = vmul.f32 0.6931472, %v1883_v55  ;;  %v1196_v51 = vadd.f32 %v1175_v42, %v1132_v11  ;;  %1900 = vrcp.f32 %v1631_v59  ;;  %v1885_v28 = vpop.eup %1884  ;;  %v929_v44 = vld [vmem:[#allocation3 + $0x38] sm:$0xff]  ;;  %v1513_v42 = vld [vmem:[#allocation5 + $0x20] sm:$0xff] }
 0x348   :  { %1902 = vpow2.f32 %v964_v57  ;;  %v1499_v29 = vld [vmem:[#allocation4 + $0x30] sm:$0xff]  ;;  %v1535_v61 = vmul.f32 %v1519_v30, %v1487_v4 }
 0x349   :  { %v1542_v38 = vsub.f32 %v1494_v27, %v1526_v25  ;;  %v1483_v3 = vadd.f32 %v1458_v63, %v1419_v9  ;;  %1212 = vst.msk [vmem:[#allocation4 + $0x50] sm:$0xff] %vm28_vm15, %v1196_v51  ;;  %1904 = vrcp.f32 %v1625_v36  ;;  %v1583_v9 = vld [vmem:[%s3104_s4 + $0x50] sm:$0xff] }
 0x34a   :  { %v1179_v33 = vpop.xlane.xlu1 %1178  ;;  %v1887_v10 = vpop.eup %1886  ;;  %1906 = vrcp.f32 %v1633_v21  ;;  %v1521_v21 = vld [vmem:[#allocation5 + $0x60] sm:$0xff] }
 0x34b   :  { %v1558_v31 = vsub.f32 0.0, %v1542_v38  ;;  %v1531_v43 = vmul.f32 %v1515_v16, %v1483_v3  ;;  %v1198_v7 = vadd.f32 %v1179_v33, %v1134_v26  ;;  %1908 = vpow2.f32 %v980_v45  ;;  %v937_v3 = vld [vmem:[#allocation3 + $0x78] sm:$0xff]  ;;  %v1577_v16 = vld [vmem:[%s3104_s4 + $0x20] sm:$0xff]  ;;  %v1438_v33 = vld [vmem:[#allocation3 + $0x48] sm:$0xff] }
 0x34c   :  { %v1501_v47 = vld [vmem:[#allocation4 + $0x40] sm:$0xff]  ;;  %v1474_v13 = vmul.f32 0.6931472, %v1887_v10  ;;  %1910 = vrcp.f32 %v1635_v20  ;;  %v927_v10 = vld [vmem:[#allocation3 + $0x28] sm:$0xff] }
 0x34d   :  { %v1590_v50 = vmul.f32 %v1574_v6, %v1558_v31  ;;  %v1547_v46 = vsub.f32 %v1499_v29, %v1531_v43  ;;  %v1549_v54 = vsub.f32 %v1501_v47, %v1533_v53  ;;  %1214 = vst.msk [vmem:[#allocation4 + $0x60] sm:$0xff] %vm28_vm15, %v1198_v7  ;;  %1912 = vlog2.f32 %v1438_v33 }
 0x34e   :  { %v1889_v18 = vpop.eup %1888  ;;  %v1183_v49 = vpop.xlane.xlu1 %1182  ;;  %v1491_v57 = vadd.f32 %v1474_v13, %v1427_v15 }
 0x34f   :  { %v1891_v62 = vpop.eup %1890  ;;  %v1640_v58 = vmul.f32 %v1885_v28, %v1590_v50  ;;  %v1454_v1 = vmul.f32 0.6931472, %v1889_v18  ;;  %v1563_v39 = vsub.f32 0.0, %v1547_v46  ;;  %v1565_v41 = vsub.f32 0.0, %v1549_v54  ;;  %v1585_v50 = vld [vmem:[%s3104_s4 + $0x60] sm:$0xff]  ;;  %v1440_v18 = vld [vmem:[#allocation3 + $0x58] sm:$0xff] }
 0x350   :  { %v1893_v5 = vpop.eup %1892  ;;  %v1503_v2 = vld [vmem:[#allocation4 + $0x50] sm:$0xff]  ;;  %v1200_v11 = vadd.f32 %v1183_v49, %v1136_v48  ;;  %v1539_v28 = vmul.f32 %v1523_v56, %v1491_v57  ;;  %1914 = vlog2.f32 %v1440_v18  ;;  %v1420_v56 = vld [vmem:[#allocation2 + $0x38] sm:$0xff] }
 0x351   :  { %v1895_v35 = vpop.eup %1894  ;;  %1670 = vst.msk [vmem:[%s3105_s6 + $0x8] sm:$0xff] %vm28_vm15, %v1640_v58  ;;  %v1481_v55 = vadd.f32 %v1454_v1, %v1417_v0  ;;  %v1595_v60 = vmul.f32 %v1579_v14, %v1563_v39  ;;  %v1597_v59 = vmul.f32 %v1581_v32, %v1565_v41  ;;  %v1551_v17 = vsub.f32 %v1503_v2, %v1535_v61  ;;  %v1587_v32 = vld [vmem:[%s3104_s4 + $0x70] sm:$0xff]  ;;  %v935_v39 = vld [vmem:[#allocation3 + $0x68] sm:$0xff] }
 0x352   :  { %v1897_v37 = vpop.eup %1896  ;;  %1216 = vst.msk [vmem:[#allocation4 + $0x70] sm:$0xff] %vm28_vm15, %v1200_v11  ;;  %v993_v27 = vmul.f32 %v1895_v35, %v929_v44  ;;  %v1614_v44 = vld [vmem:[#allocation6 + $0x48] sm:$0xff] }
 0x353   :  { %v1529_v25 = vmul.f32 %v1513_v42, %v1481_v55  ;;  %v1470_v63 = vmul.f32 0.6931472, %v1897_v37  ;;  %v1650_v24 = vmul.f32 %v1891_v62, %v1595_v60  ;;  %v1654_v51 = vmul.f32 %v1893_v5, %v1597_v59  ;;  %v1899_v26 = vpop.eup %1898  ;;  %v1612_v59 = vld [vmem:[#allocation6 + $0x38] sm:$0xff] }
 0x354   :  { %v1567_v12 = vsub.f32 0.0, %v1551_v17  ;;  %v1901_v4 = vpop.eup %1900  ;;  %v1505_v7 = vld [vmem:[#allocation4 + $0x60] sm:$0xff]  ;;  %v1001_v22 = vmul.f32 %v1899_v26, %v937_v3  ;;  %v1129_v17 = vld [vmem:[#allocation4 + $0x38] sm:$0xff]  ;;  %v1628_v15 = vmax.f32 %v1612_v59, 1.0 }
 0x355   :  { %v1545_v36 = vsub.f32 %v1497_v8, %v1529_v25  ;;  %1675 = vst.msk [vmem:[%s3105_s6 + $0x30] sm:$0xff] %vm28_vm15, %v1650_v24  ;;  %1677 = vst.msk [vmem:[%s3105_s6 + $0x40] sm:$0xff] %vm28_vm15, %v1654_v51  ;;  %v1489_v19 = vadd.f32 %v1470_v63, %v1425_v52  ;;  %v1017_v38 = vpop.xlane.xlu0 %1016  ;;  %v1903_v40 = vpop.eup %1902  ;;  %v1630_v24 = vmax.f32 %v1614_v44, 1.0  ;;  %v1616_v8 = vld [vmem:[#allocation6 + $0x58] sm:$0xff] }
 0x356   :  { %v1599_v34 = vmul.f32 %v1583_v9, %v1567_v12  ;;  %v1041_v6 = vadd.f32 %v1017_v38, %v993_v27  ;;  %v1905_v30 = vpop.eup %1904  ;;  %v991_v49 = vmul.f32 %v1903_v40, %v927_v10  ;;  %v1131_v9 = vld [vmem:[#allocation4 + $0x48] sm:$0xff]  ;;  %v1632_v3 = vmax.f32 %v1616_v8, 1.0 }
 0x357   :  { %v1561_v31 = vsub.f32 0.0, %v1545_v36  ;;  %v1537_v43 = vmul.f32 %v1521_v21, %v1489_v19  ;;  %v1907_v48 = vpop.eup %1906  ;;  %v1133_v36 = vld [vmem:[#allocation4 + $0x58] sm:$0xff]  ;;  %v1610_v38 = vld [vmem:[#allocation6 + $0x28] sm:$0xff] }
 0x358   :  { %v1658_v53 = vmul.f32 %v1901_v4, %v1599_v34  ;;  %1058 = vst.msk [vmem:[#allocation3 + $0x38] sm:$0xff] %vm28_vm15, %v1041_v6  ;;  %v1909_v62 = vpop.eup %1908  ;;  %v1422_v21 = vld [vmem:[#allocation2 + $0x48] sm:$0xff] }
 0x359   :  { %v1593_v23 = vmul.f32 %v1577_v16, %v1561_v31  ;;  %v1553_v45 = vsub.f32 %v1505_v7, %v1537_v43  ;;  %v1507_v29 = vld [vmem:[#allocation4 + $0x70] sm:$0xff]  ;;  %v1033_v47 = vpop.xlane.xlu0 %1032  ;;  %v1911_v0 = vpop.eup %1910  ;;  %v999_v35 = vmul.f32 %v1909_v62, %v935_v39  ;;  %v1135_v31 = vld [vmem:[#allocation4 + $0x68] sm:$0xff]  ;;  %v1626_v43 = vmax.f32 %v1610_v38, 1.0  ;;  %v1580_v62 = vld [vmem:[%s3104_s4 + $0x38] sm:$0xff] }
 0x35a   :  { %1679 = vst.msk [vmem:[%s3105_s6 + $0x50] sm:$0xff] %vm28_vm15, %v1658_v53  ;;  %v1555_v46 = vsub.f32 %v1507_v29, %v1539_v28  ;;  %v1049_v54 = vadd.f32 %v1033_v47, %v1001_v22  ;;  %v1913_v63 = vpop.eup %1912  ;;  %v1618_v53 = vld [vmem:[#allocation6 + $0x68] sm:$0xff]  ;;  %v1424_v28 = vld [vmem:[#allocation2 + $0x58] sm:$0xff] }
 0x35b   :  { %v1646_v20 = vmul.f32 %v1905_v30, %v1593_v23  ;;  %v1569_v14 = vsub.f32 0.0, %v1553_v45  ;;  %v1464_v12 = vmul.f32 0.6931472, %v1913_v63  ;;  %v1516_v22 = vld [vmem:[#allocation5 + $0x38] sm:$0xff]  ;;  %v1518_v40 = vld [vmem:[#allocation5 + $0x48] sm:$0xff] }
 0x35c   :  { %v1571_v61 = vsub.f32 0.0, %v1555_v46  ;;  %1066 = vst.msk [vmem:[#allocation3 + $0x78] sm:$0xff] %vm28_vm15, %v1049_v54  ;;  %v1620_v45 = vld [vmem:[#allocation6 + $0x78] sm:$0xff]  ;;  %v1426_v8 = vld [vmem:[#allocation2 + $0x68] sm:$0xff] }
 0x35d   :  { %1673 = vst.msk [vmem:[%s3105_s6 + $0x20] sm:$0xff] %vm28_vm15, %v1646_v20  ;;  %v1601_v58 = vmul.f32 %v1585_v50, %v1569_v14  ;;  %v1013_v1 = vpop.xlane.xlu0 %1012  ;;  %v1915_v27 = vpop.eup %1914  ;;  %v1486_v4 = vadd.f32 %v1464_v12, %v1422_v21  ;;  %v1634_v50 = vmax.f32 %v1618_v53, 1.0  ;;  %v1137_v14 = vld [vmem:[#allocation4 + $0x78] sm:$0xff]  ;;  %v1498_v12 = vld [vmem:[#allocation4 + $0x28] sm:$0xff] }
 0x35e   :  { %v1603_v41 = vmul.f32 %v1587_v32, %v1571_v61  ;;  %v1039_v5 = vadd.f32 %v1013_v1, %v991_v49  ;;  %v1468_v34 = vmul.f32 0.6931472, %v1915_v27  ;;  %v1636_v61 = vmax.f32 %v1620_v45, 1.0  ;;  %v1520_v49 = vld [vmem:[#allocation5 + $0x58] sm:$0xff]  ;;  %v1578_v38 = vld [vmem:[%s3104_s4 + $0x28] sm:$0xff] }
 0x35f   :  { %v1662_v13 = vmul.f32 %v1907_v48, %v1601_v58  ;;  %v1436_v2 = vld [vmem:[#allocation3 + $0x38] sm:$0xff]  ;;  %v1534_v47 = vmul.f32 %v1518_v40, %v1486_v4  ;;  %v1582_v58 = vld [vmem:[%s3104_s4 + $0x48] sm:$0xff] }
 0x360   :  { %v1666_v11 = vmul.f32 %v1911_v0, %v1603_v41  ;;  %1916 = vlog2.f32 %v1436_v2  ;;  %1056 = vst.msk [vmem:[#allocation3 + $0x28] sm:$0xff] %vm28_vm15, %v1039_v5  ;;  %v1488_v10 = vadd.f32 %v1468_v34, %v1424_v28  ;;  %v1418_v2 = vld [vmem:[#allocation2 + $0x28] sm:$0xff]  ;;  %v1588_v45 = vld [vmem:[%s3104_s4 + $0x78] sm:$0xff] }
 0x361   :  { %1681 = vst.msk [vmem:[%s3105_s6 + $0x60] sm:$0xff] %vm28_vm15, %v1662_v13  ;;  %v1029_v55 = vpop.xlane.xlu0 %1028  ;;  %v1586_v28 = vld [vmem:[%s3104_s4 + $0x68] sm:$0xff] }
 0x362   :  { %1683 = vst.msk [vmem:[%s3105_s6 + $0x70] sm:$0xff] %vm28_vm15, %v1666_v11  ;;  %v1047_v60 = vadd.f32 %v1029_v55, %v999_v35  ;;  %v1536_v0 = vmul.f32 %v1520_v49, %v1488_v10 }
 0x363   :  { %v1444_v37 = vld [vmem:[#allocation3 + $0x78] sm:$0xff] }
 0x364   :  { %1064 = vst.msk [vmem:[#allocation3 + $0x68] sm:$0xff] %vm28_vm15, %v1047_v60  ;;  %1918 = vlog2.f32 %v1444_v37 }
 0x365   :  { %v1169_v42 = vpop.xlane.xlu0 %1168 }
 0x366   :  { %v1193_v25 = vadd.f32 %v1169_v42, %v1129_v17 }
 0x367   :  { %v1434_v51 = vld [vmem:[#allocation3 + $0x28] sm:$0xff] }
 0x368   :  { %1920 = vlog2.f32 %v1434_v51  ;;  %1209 = vst.msk [vmem:[#allocation4 + $0x38] sm:$0xff] %vm28_vm15, %v1193_v25  ;;  %v1428_v25 = vld [vmem:[#allocation2 + $0x78] sm:$0xff] }
 0x369   :  { %v1173_v52 = vpop.xlane.xlu0 %1172  ;;  %1922 = vrcp.f32 %v1628_v15  ;;  %v1514_v15 = vld [vmem:[#allocation5 + $0x28] sm:$0xff] }
 0x36a   :  { %v1195_v57 = vadd.f32 %v1173_v52, %v1131_v9  ;;  %1924 = vrcp.f32 %v1630_v24  ;;  %v1584_v52 = vld [vmem:[%s3104_s4 + $0x58] sm:$0xff] }
 0x36b   :  { %v1442_v26 = vld [vmem:[#allocation3 + $0x68] sm:$0xff] }
 0x36c   :  { %1926 = vlog2.f32 %v1442_v26  ;;  %1211 = vst.msk [vmem:[#allocation4 + $0x48] sm:$0xff] %vm28_vm15, %v1195_v57 }
 0x36d   :  { %v1917_v19 = vpop.eup %1916  ;;  %v1177_v16 = vpop.xlane.xlu0 %1176  ;;  %1928 = vrcp.f32 %v1632_v3 }
 0x36e   :  { %v1460_v6 = vmul.f32 0.6931472, %v1917_v19  ;;  %v1197_v33 = vadd.f32 %v1177_v16, %v1133_v36  ;;  %1930 = vrcp.f32 %v1626_v43  ;;  %v1522_v19 = vld [vmem:[#allocation5 + $0x68] sm:$0xff]  ;;  %v1524_v16 = vld [vmem:[#allocation5 + $0x78] sm:$0xff] }
 0x36f   :  { %v1500_v46 = vld [vmem:[#allocation4 + $0x38] sm:$0xff]  ;;  %1932 = vrcp.f32 %v1634_v50 }
 0x370   :  { %v1484_v7 = vadd.f32 %v1460_v6, %v1420_v56  ;;  %1213 = vst.msk [vmem:[#allocation4 + $0x58] sm:$0xff] %vm28_vm15, %v1197_v33  ;;  %1934 = vrcp.f32 %v1636_v61 }
 0x371   :  { %v1181_v23 = vpop.xlane.xlu0 %1180  ;;  %v1919_v48 = vpop.eup %1918 }
 0x372   :  { %v1532_v29 = vmul.f32 %v1516_v22, %v1484_v7  ;;  %v1199_v30 = vadd.f32 %v1181_v23, %v1135_v31  ;;  %v1476_v11 = vmul.f32 0.6931472, %v1919_v48 }
 0x373   :  { %v1502_v54 = vld [vmem:[#allocation4 + $0x48] sm:$0xff] }
 0x374   :  { %v1548_v18 = vsub.f32 %v1500_v46, %v1532_v29  ;;  %v1550_v20 = vsub.f32 %v1502_v54, %v1534_v47  ;;  %1215 = vst.msk [vmem:[#allocation4 + $0x68] sm:$0xff] %vm28_vm15, %v1199_v30  ;;  %v1492_v27 = vadd.f32 %v1476_v11, %v1428_v25 }
 0x375   :  { %v1921_v32 = vpop.eup %1920  ;;  %v1185_v1 = vpop.xlane.xlu0 %1184 }
 0x376   :  { %v1456_v39 = vmul.f32 0.6931472, %v1921_v32  ;;  %v1564_v41 = vsub.f32 0.0, %v1548_v18  ;;  %v1566_v5 = vsub.f32 0.0, %v1550_v20  ;;  %v1923_v13 = vpop.eup %1922  ;;  %v1201_v55 = vadd.f32 %v1185_v1, %v1137_v14 }
 0x377   :  { %v1504_v35 = vld [vmem:[#allocation4 + $0x58] sm:$0xff]  ;;  %v1925_v60 = vpop.eup %1924  ;;  %v1540_v56 = vmul.f32 %v1524_v16, %v1492_v27 }
 0x378   :  { %v1482_v59 = vadd.f32 %v1456_v39, %v1418_v2  ;;  %v1596_v17 = vmul.f32 %v1580_v62, %v1564_v41  ;;  %v1598_v44 = vmul.f32 %v1582_v58, %v1566_v5  ;;  %v1552_v37 = vsub.f32 %v1504_v35, %v1536_v0  ;;  %1217 = vst.msk [vmem:[#allocation4 + $0x78] sm:$0xff] %vm28_vm15, %v1201_v55 }
 0x379   :  { %v1927_v42 = vpop.eup %1926 }
 0x37a   :  { %v1530_v63 = vmul.f32 %v1514_v15, %v1482_v59  ;;  %v1472_v24 = vmul.f32 0.6931472, %v1927_v42  ;;  %v1652_v51 = vmul.f32 %v1923_v13, %v1596_v17  ;;  %v1656_v9 = vmul.f32 %v1925_v60, %v1598_v44  ;;  %v1929_v21 = vpop.eup %1928 }
 0x37b   :  { %v1568_v57 = vsub.f32 0.0, %v1552_v37  ;;  %v1506_v33 = vld [vmem:[#allocation4 + $0x68] sm:$0xff]  ;;  %v1931_v7 = vpop.eup %1930 }
 0x37c   :  { %v1546_v26 = vsub.f32 %v1498_v12, %v1530_v63  ;;  %1676 = vst.msk [vmem:[%s3105_s6 + $0x38] sm:$0xff] %vm28_vm15, %v1652_v51  ;;  %1678 = vst.msk [vmem:[%s3105_s6 + $0x48] sm:$0xff] %vm28_vm15, %v1656_v9  ;;  %v1490_v36 = vadd.f32 %v1472_v24, %v1426_v8  ;;  %v1933_v47 = vpop.eup %1932 }
 0x37d   :  { %v1600_v3 = vmul.f32 %v1584_v52, %v1568_v57  ;;  %v1935_v50 = vpop.eup %1934 }
 0x37e   :  { %v1562_v34 = vsub.f32 0.0, %v1546_v26  ;;  %v1538_v6 = vmul.f32 %v1522_v19, %v1490_v36 }
 0x37f   :  { %v1660_v4 = vmul.f32 %v1929_v21, %v1600_v3  ;;  %v1508_v53 = vld [vmem:[#allocation4 + $0x78] sm:$0xff] }
 0x380   :  { %v1594_v31 = vmul.f32 %v1578_v38, %v1562_v34  ;;  %v1554_v43 = vsub.f32 %v1506_v33, %v1538_v6  ;;  %v1556_v22 = vsub.f32 %v1508_v53, %v1540_v56 }
 0x381   :  { %1680 = vst.msk [vmem:[%s3105_s6 + $0x58] sm:$0xff] %vm28_vm15, %v1660_v4 }
 0x382   :  { %v1648_v40 = vmul.f32 %v1931_v7, %v1594_v31  ;;  %v1570_v23 = vsub.f32 0.0, %v1554_v43  ;;  %v1572_v29 = vsub.f32 0.0, %v1556_v22 }
 0x384   :  { %1674 = vst.msk [vmem:[%s3105_s6 + $0x28] sm:$0xff] %vm28_vm15, %v1648_v40  ;;  %v1602_v10 = vmul.f32 %v1586_v28, %v1570_v23  ;;  %v1604_v30 = vmul.f32 %v1588_v45, %v1572_v29 }
 0x386   :  { %v1664_v46 = vmul.f32 %v1933_v47, %v1602_v10  ;;  %v1668_v54 = vmul.f32 %v1935_v50, %v1604_v30 }
 0x388   :  { %1682 = vst.msk [vmem:[%s3105_s6 + $0x68] sm:$0xff] %vm28_vm15, %v1664_v46  ;;  %1684 = vst.msk [vmem:[%s3105_s6 + $0x78] sm:$0xff] %vm28_vm15, %v1668_v54 }

</bundles_post_ra>
